<compile_context>
chip_gen: v7x
topology: tpu7x:2x2x1
jax: 0.10.0
libtpu: 0.0.40
codegen_flags: <defaults>
</compile_context>

<pallas_src>
import numpy as np
import jax
import jax.numpy as jnp
from jax import lax
from jax.experimental import pallas as pl
from jax.experimental.pallas import tpu as pltpu


# ----------------------------- Pallas kernel --------------------------------
def bilstm_kernel(x_ref, len_ref, w_in_ref, b_in_ref, whh_f_ref, whh_b_ref,
                  hc0_ref, wpf_ref, wpb_ref, bp_ref,
                  out_ref,
                  xgf_ref, xgb_ref, hf_ref, hb_ref):
    T, Bt, D = x_ref.shape
    H = hf_ref.shape[2]
    H3, H4 = 3 * H, 4 * H

    lens = len_ref[...]                                     # (Bt, 1) int32

    # ---- Stage ALL timesteps' input->gate projections with ONE bf16 MXU matmul.
    # Dense (D, 8H) weight; columns = [fwd gates 4H | bwd gates 4H], per-direction
    # gate order [i | f | o | g].
    xb = x_ref[...].astype(jnp.bfloat16).reshape(T * Bt, D)
    xg = jnp.dot(xb, w_in_ref[...], preferred_element_type=jnp.float32) + b_in_ref[...]
    xg = xg.reshape(T, Bt, 2 * H4)
    xgf_ref[...] = xg[:, :, :H4]
    xgb_ref[...] = xg[:, :, H4:]

    whh_f = whh_f_ref[...]                                  # (H, 4H) f32
    whh_b = whh_b_ref[...]
    hc0 = hc0_ref[...]                                      # (4, H): [h0f, h0b, c0f, c0b]
    h0f = jnp.broadcast_to(hc0[0:1, :], (Bt, H))            # hoisted out of the loop
    h0b = jnp.broadcast_to(hc0[1:2, :], (Bt, H))
    c0f = jnp.broadcast_to(hc0[2:3, :], (Bt, H))
    c0b = jnp.broadcast_to(hc0[3:4, :], (Bt, H))

    def lstm_cell(g, c):
        # 5H transcendentals per direction per step (was 9H with full-width
        # sigmoid + tanh): sigmoid on the contiguous [i|f|o] block, tanh on the
        # candidate and on c.
        sg = jax.nn.sigmoid(g[:, :H3])
        gg = jnp.tanh(g[:, H3:])
        c_new = sg[:, H:2 * H] * c + sg[:, :H] * gg
        h_new = sg[:, 2 * H:] * jnp.tanh(c_new)
        return h_new, c_new

    def step(s, carry):
        h_f, c_f, h_b, c_b = carry                          # f32 (Bt, H) each
        tb = T - 1 - s                                      # absolute time of bwd dir

        # Backward direction restarts from the trainable init at its last valid
        # token (tb == len-1).  Earlier iterations of shorter rows run on padding
        # but their outputs are masked below -> packed-sequence semantics.
        restart = (lens - 1) == tb                          # (Bt, 1) bool
        h_b = jnp.where(restart, h0b, h_b)
        c_b = jnp.where(restart, c0b, c_b)

        # f32 recurrent dots, one per direction (no zero-block waste, no bf16
        # re-quantization of the carried state).
        g_f = xgf_ref[s] + jnp.dot(h_f, whh_f, preferred_element_type=jnp.float32)
        g_b = xgb_ref[tb] + jnp.dot(h_b, whh_b, preferred_element_type=jnp.float32)

        h_f, c_f = lstm_cell(g_f, c_f)
        h_b, c_b = lstm_cell(g_b, c_b)

        # Per-step stores at the absolute time index (leading-axis dynamic index),
        # padded positions zeroed.  bf16 scratch: projection consumes bf16 anyway.
        hf_ref[s] = (h_f * (s < lens).astype(jnp.float32)).astype(jnp.bfloat16)
        hb_ref[tb] = (h_b * (tb < lens).astype(jnp.float32)).astype(jnp.bfloat16)
        return (h_f, c_f, h_b, c_b)

    lax.fori_loop(0, T, step, (h0f, c0f, h0b, c0b),
                  unroll=True if T <= 8 else 4)

    # ---- reduce_dim Linear over the whole (T*Bt) slab: bf16 MXU, f32 accumulate.
    hf = hf_ref[...].reshape(T * Bt, H)
    hb = hb_ref[...].reshape(T * Bt, H)
    enc = (jnp.dot(hf, wpf_ref[...], preferred_element_type=jnp.float32)
           + jnp.dot(hb, wpb_ref[...], preferred_element_type=jnp.float32)
           + bp_ref[...])
    out_ref[...] = enc.reshape(T, Bt, out_ref.shape[2]).astype(out_ref.dtype)


# ----------------------------- wrapper helpers -------------------------------
def _gate_cols(w, H):
    """(4H, X) in PyTorch gate-row order [i,f,g,o] -> (X, 4H) columns [i,f,o,g]."""
    i, f, g, o = w[:H], w[H:2 * H], w[2 * H:3 * H], w[3 * H:]
    return jnp.concatenate([i, f, o, g], axis=0).T


def _gate_bias(b, H):
    """(4H,) PyTorch order [i,f,g,o] -> (4H,) order [i,f,o,g]."""
    return jnp.concatenate([b[:H], b[H:2 * H], b[3 * H:], b[2 * H:3 * H]])


def _vmem_need(tile, T, D, H, HOUT):
    """Per-batch-tile VMEM footprint estimate in bytes."""
    H4, H8 = 4 * H, 8 * H
    xblk = 2 * T * tile * D * 4            # double-buffered x block (f32)
    oblk = 2 * T * tile * HOUT * 4         # double-buffered out block (f32)
    xg = 2 * T * tile * H4 * 4             # xgf + xgb scratch (f32)
    hid = 2 * T * tile * H * 2             # hf + hb scratch (bf16)
    wts = (D * H8 * 2 + H8 * 4 + 2 * H * H4 * 4 + 4 * H * 4
           + 2 * H * HOUT * 2 + HOUT * 4)  # single-buffered weights
    return xblk + oblk + xg + hid + wts


def _pick_batch_tile(B, T, D, H, HOUT, budget_bytes):
    fitting = [t for t in (256, 128, 64, 32, 16, 8)
               if B % t == 0 and _vmem_need(t, T, D, H, HOUT) <= budget_bytes]
    if fitting:
        tile = fitting[0]
        # prefer >= 2 grid tiles so ("parallel",) can split across v7x's 2 TCs
        if tile == B and len(fitting) > 1:
            tile = fitting[1]
        return tile
    return B if B <= 8 else max(t for t in range(1, 9) if B % t == 0)


# ----------------------------- wrapper ---------------------------------------
def bilstm_encoder_forward(x, lengths, params, *, batch_tile=None):
    B, T, D = x.shape
    H = params["whh_f"].shape[1]
    HOUT = params["wproj"].shape[0]
    H4, H8 = 4 * H, 8 * H

    # lengths clamped to [1, T] (PyTorch clamps to >= 1; > T would truncate).
    lens = jnp.clip(lengths.astype(jnp.int32), 1, T).reshape(B, 1)

    # Dense combined input->gate weight (no zero blocks), gate order [i,f,o,g].
    w_in = jnp.concatenate([_gate_cols(params["wih_f"], H),
                            _gate_cols(params["wih_b"], H)],
                           axis=1).astype(jnp.bfloat16)                     # (D, 8H)
    b_in = jnp.concatenate([_gate_bias(params["bih_f"] + params["bhh_f"], H),
                            _gate_bias(params["bih_b"] + params["bhh_b"], H)]
                           ).reshape(1, H8)                                 # (1, 8H) f32
    whh_f = _gate_cols(params["whh_f"], H)                                  # (H, 4H) f32
    whh_b = _gate_cols(params["whh_b"], H)
    hc0 = jnp.concatenate([params["h0"][:, 0, :], params["c0"][:, 0, :]],
                          axis=0)                                           # (4, H) f32

    wpT = params["wproj"].T                           # (2H, HOUT): rows [fwd H | bwd H]
    wpf = wpT[:H].astype(jnp.bfloat16)
    wpb = wpT[H:].astype(jnp.bfloat16)
    bp = params["bproj"].reshape(1, HOUT)

    # Time-major x, single copy (the flipped copy / feature doubling is gone).
    x_tm = jnp.transpose(x.astype(jnp.float32), (1, 0, 2))                  # (T, B, D)

    budget = 44 * 1024 * 1024          # v7x-safe (64 MiB physical VMEM) with headroom
    if batch_tile is None:
        batch_tile = _pick_batch_tile(B, T, D, H, HOUT, budget)
    assert B % batch_tile == 0, "B must be divisible by batch_tile"
    grid = (B // batch_tile,)

    vmem_limit = int(min(max(_vmem_need(batch_tile, T, D, H, HOUT) + 12 * 2**20,
                             32 * 2**20),
                         96 * 2**20))

    def const_spec(shape):
        # weights: constant block index, single-buffered (no double-buffer waste)
        return pl.BlockSpec(shape, lambda b, _n=len(shape): (0,) * _n,
                            pipeline_mode=pl.Buffered(1))

    out_tm = pl.pallas_call(
        bilstm_kernel,
        out_shape=jax.ShapeDtypeStruct((T, B, HOUT), jnp.float32),
        grid_spec=pltpu.PrefetchScalarGridSpec(
            num_scalar_prefetch=0,
            grid=grid,
            in_specs=[
                pl.BlockSpec((T, batch_tile, D), lambda b: (0, b, 0)),   # x (time-major)
                pl.BlockSpec((batch_tile, 1), lambda b: (b, 0)),         # lengths
                const_spec((D, H8)),                                     # w_in (bf16)
                const_spec((1, H8)),                                     # b_in
                const_spec((H, H4)),                                     # whh_f (f32)
                const_spec((H, H4)),                                     # whh_b (f32)
                const_spec((4, H)),                                      # h0/c0 inits
                const_spec((H, HOUT)),                                   # wproj fwd (bf16)
                const_spec((H, HOUT)),                                   # wproj bwd (bf16)
                const_spec((1, HOUT)),                                   # bproj
            ],
            out_specs=pl.BlockSpec((T, batch_tile, HOUT), lambda b: (0, b, 0)),
            scratch_shapes=[
                pltpu.VMEM((T, batch_tile, H4), jnp.float32),   # fwd staged gate inputs
                pltpu.VMEM((T, batch_tile, H4), jnp.float32),   # bwd staged gate inputs
                pltpu.VMEM((T, batch_tile, H), jnp.bfloat16),   # fwd hidden states
                pltpu.VMEM((T, batch_tile, H), jnp.bfloat16),   # bwd hidden states
            ],
        ),
        compiler_params=pltpu.CompilerParams(
            dimension_semantics=("parallel",),      # batch tiles -> megacore / v7x 2 TCs
            vmem_limit_bytes=vmem_limit,
        ),
    )(x_tm, lens, w_in, b_in, whh_f, whh_b, hc0, wpf, wpb, bp)

    return jnp.transpose(out_tm, (1, 0, 2))         # back to batch-first (B, T, HOUT)


# ----------------------------- parameter init --------------------------------
def init_params(key, input_size, hidden_size):
    H, D = hidden_size, input_size
    k_lstm = 1.0 / np.sqrt(H)
    k_lin = 1.0 / np.sqrt(2 * H)
    keys = jax.random.split(key, 10)

    def u(kk, shape, scale):
        return jax.random.uniform(kk, shape, jnp.float32, -scale, scale)

    return {
        "wih_f": u(keys[0], (4 * H, D), k_lstm),
        "whh_f": u(keys[1], (4 * H, H), k_lstm),
        "bih_f": u(keys[2], (4 * H,), k_lstm),
        "bhh_f": u(keys[3], (4 * H,), k_lstm),
        "wih_b": u(keys[4], (4 * H, D), k_lstm),
        "whh_b": u(keys[5], (4 * H, H), k_lstm),
        "bih_b": u(keys[6], (4 * H,), k_lstm),
        "bhh_b": u(keys[7], (4 * H,), k_lstm),
        "wproj": u(keys[8], (H, 2 * H), k_lin),
        "bproj": u(keys[9], (H,), k_lin),
        "h0": jnp.zeros((2, 1, H), jnp.float32),   # trainable init (zeros, as in module)
        "c0": jnp.zeros((2, 1, H), jnp.float32),
    }


# ----------------------------- numpy reference --------------------------------
def _sigmoid(z):
    return 1.0 / (1.0 + np.exp(-z))


def reference(x, lengths, P):
    x = np.asarray(x, np.float32)
    lengths = np.clip(np.asarray(lengths), 1, x.shape[1])
    B, T, D = x.shape
    H = np.asarray(P["whh_f"]).shape[1]
    h0 = np.asarray(P["h0"], np.float32)
    c0 = np.asarray(P["c0"], np.float32)

    def run_dir(wih, whh, b, h_init, c_init, reverse):
        wih, whh, b = map(np.asarray, (wih, whh, b))
        out = np.zeros((B, T, H), np.float32)
        for bi in range(B):
            L = int(lengths[bi])
            h = h_init.copy()
            c = c_init.copy()
            ts = range(L - 1, -1, -1) if reverse else range(L)
            for t in ts:
                g = x[bi, t] @ wih.T + h @ whh.T + b
                i = _sigmoid(g[:H]); f = _sigmoid(g[H:2 * H])
                gg = np.tanh(g[2 * H:3 * H]); o = _sigmoid(g[3 * H:])
                c = f * c + i * gg
                h = o * np.tanh(c)
                out[bi, t] = h
        return out

    of = run_dir(P["wih_f"], P["whh_f"],
                 np.asarray(P["bih_f"]) + np.asarray(P["bhh_f"]),
                 h0[0, 0], c0[0, 0], False)
    ob = run_dir(P["wih_b"], P["whh_b"],
                 np.asarray(P["bih_b"]) + np.asarray(P["bhh_b"]),
                 h0[1, 0], c0[1, 0], True)
    enc = np.concatenate([of, ob], -1) @ np.asarray(P["wproj"]).T + np.asarray(P["bproj"])
    return enc


# ----------------------------- main -------------------------------------------
if __name__ == "__main__":
    B, T, D, H = 2, 8, 16, 32

    key = jax.random.PRNGKey(0)
    k_x, k_p, k_h, k_c = jax.random.split(key, 4)
    x = jax.random.normal(k_x, (B, T, D), jnp.float32)
    params = init_params(k_p, D, H)

    # Test 1: module-default zero h0/c0, mixed lengths (max(lengths) == T).
    lengths = jnp.array([8, 5], jnp.int32)
    out = jax.block_until_ready(bilstm_encoder_forward(x, lengths, params))
    np.testing.assert_allclose(np.asarray(out), reference(x, lengths, params),
                               rtol=2e-2, atol=2e-2)

    # Test 2: nonzero trainable h0/c0 and a short first row -> validates the
    # trainable-init broadcast and the backward "restart at t = len-1" path.
    params2 = dict(params)
    params2["h0"] = 0.5 * jax.random.normal(k_h, (2, 1, H), jnp.float32)
    params2["c0"] = 0.5 * jax.random.normal(k_c, (2, 1, H), jnp.float32)
    lengths2 = jnp.array([3, 8], jnp.int32)
    out2 = jax.block_until_ready(bilstm_encoder_forward(x, lengths2, params2))
    np.testing.assert_allclose(np.asarray(out2), reference(x, lengths2, params2),
                               rtol=2e-2, atol=2e-2)

    print("KERNEL_OK")
</pallas_src>

<mosaic_0001>
module attributes {stable_mosaic.version = 11 : i64} {
  func.func @bilstm_kernel(%arg0: i32, %arg1: memref<8x2x16xf32, #tpu.memory_space<vmem>>, %arg2: memref<2x1xi32, #tpu.memory_space<vmem>>, %arg3: memref<16x256xbf16, #tpu.memory_space<vmem>>, %arg4: memref<1x256xf32, #tpu.memory_space<vmem>>, %arg5: memref<32x128xf32, #tpu.memory_space<vmem>>, %arg6: memref<32x128xf32, #tpu.memory_space<vmem>>, %arg7: memref<4x32xf32, #tpu.memory_space<vmem>>, %arg8: memref<32x32xbf16, #tpu.memory_space<vmem>>, %arg9: memref<32x32xbf16, #tpu.memory_space<vmem>>, %arg10: memref<1x32xf32, #tpu.memory_space<vmem>>, %arg11: memref<8x2x32xf32, #tpu.memory_space<vmem>>, %arg12: memref<8x2x128xf32, #tpu.memory_space<vmem>>, %arg13: memref<8x2x128xf32, #tpu.memory_space<vmem>>, %arg14: memref<8x2x32xbf16, #tpu.memory_space<vmem>>, %arg15: memref<8x2x32xbf16, #tpu.memory_space<vmem>>) attributes {dimension_semantics = [#tpu.dimension_semantics<parallel>], iteration_bounds = array<i64: 1>, scalar_prefetch = 0 : i64, scratch_operands = 4 : i64, tpu.core_type = #tpu.core_type<tc>, window_params = [{transform_indices = @transform_0, window_bounds = array<i64: 8, 2, 16>}, {transform_indices = @transform_1, window_bounds = array<i64: 2, 1>}, {pipeline_mode = #tpu.pipeline_mode<synchronous>, transform_indices = @transform_2, window_bounds = array<i64: 16, 256>}, {pipeline_mode = #tpu.pipeline_mode<synchronous>, transform_indices = @transform_3, window_bounds = array<i64: 1, 256>}, {pipeline_mode = #tpu.pipeline_mode<synchronous>, transform_indices = @transform_4, window_bounds = array<i64: 32, 128>}, {pipeline_mode = #tpu.pipeline_mode<synchronous>, transform_indices = @transform_5, window_bounds = array<i64: 32, 128>}, {pipeline_mode = #tpu.pipeline_mode<synchronous>, transform_indices = @transform_6, window_bounds = array<i64: 4, 32>}, {pipeline_mode = #tpu.pipeline_mode<synchronous>, transform_indices = @transform_7, window_bounds = array<i64: 32, 32>}, {pipeline_mode = #tpu.pipeline_mode<synchronous>, transform_indices = @transform_8, window_bounds = array<i64: 32, 32>}, {pipeline_mode = #tpu.pipeline_mode<synchronous>, transform_indices = @transform_9, window_bounds = array<i64: 1, 32>}, {transform_indices = @transform_10, window_bounds = array<i64: 8, 2, 32>}]} {
    %c0 = arith.constant 0 : index
    %c0_0 = arith.constant 0 : index
    %0 = vector.load %arg2[%c0, %c0_0] : memref<2x1xi32, #tpu.memory_space<vmem>>, vector<2x1xi32>
    %c0_1 = arith.constant 0 : index
    %c0_2 = arith.constant 0 : index
    %c0_3 = arith.constant 0 : index
    %1 = vector.load %arg1[%c0_1, %c0_2, %c0_3] : memref<8x2x16xf32, #tpu.memory_space<vmem>>, vector<8x2x16xf32>
    %2 = arith.truncf %1 : vector<8x2x16xf32> to vector<8x2x16xbf16>
    %3 = vector.shape_cast %2 : vector<8x2x16xbf16> to vector<16x16xbf16>
    %c0_4 = arith.constant 0 : index
    %c0_5 = arith.constant 0 : index
    %4 = vector.load %arg3[%c0_4, %c0_5] : memref<16x256xbf16, #tpu.memory_space<vmem>>, vector<16x256xbf16>
    %cst = arith.constant dense<0.000000e+00> : vector<16x256xf32>
    %5 = tpu.matmul %3, %4, %cst {dimension_numbers = #tpu.dot_dimension_numbers<[1], [0], [0], [1], [0, 0, 1, 1], [], []>} : vector<16x16xbf16>, vector<16x256xbf16>, vector<16x256xf32> -> vector<16x256xf32>
    %c0_6 = arith.constant 0 : index
    %c0_7 = arith.constant 0 : index
    %6 = vector.load %arg4[%c0_6, %c0_7] : memref<1x256xf32, #tpu.memory_space<vmem>>, vector<1x256xf32>
    %7 = vector.broadcast %6 : vector<1x256xf32> to vector<16x256xf32>
    %8 = arith.addf %5, %7 : vector<16x256xf32>
    %9 = vector.shape_cast %8 : vector<16x256xf32> to vector<8x2x256xf32>
    %10 = vector.extract_strided_slice %9 {offsets = [0, 0, 0], sizes = [8, 2, 128], strides = [1, 1, 1]} : vector<8x2x256xf32> to vector<8x2x128xf32>
    %c0_8 = arith.constant 0 : index
    %c0_9 = arith.constant 0 : index
    %c0_10 = arith.constant 0 : index
    %11 = vector.load %arg12[%c0_8, %c0_9, %c0_10] : memref<8x2x128xf32, #tpu.memory_space<vmem>>, vector<8x2x128xf32>
    tpu.vector_store %arg12[%c0_8, %c0_9, %c0_10], %10 {strides = array<i32>} : memref<8x2x128xf32, #tpu.memory_space<vmem>>, vector<8x2x128xf32>,
    %12 = vector.extract_strided_slice %9 {offsets = [0, 0, 128], sizes = [8, 2, 128], strides = [1, 1, 1]} : vector<8x2x256xf32> to vector<8x2x128xf32>
    %c0_11 = arith.constant 0 : index
    %c0_12 = arith.constant 0 : index
    %c0_13 = arith.constant 0 : index
    %13 = vector.load %arg13[%c0_11, %c0_12, %c0_13] : memref<8x2x128xf32, #tpu.memory_space<vmem>>, vector<8x2x128xf32>
    tpu.vector_store %arg13[%c0_11, %c0_12, %c0_13], %12 {strides = array<i32>} : memref<8x2x128xf32, #tpu.memory_space<vmem>>, vector<8x2x128xf32>,
    %c0_14 = arith.constant 0 : index
    %c0_15 = arith.constant 0 : index
    %14 = vector.load %arg5[%c0_14, %c0_15] : memref<32x128xf32, #tpu.memory_space<vmem>>, vector<32x128xf32>
    %c0_16 = arith.constant 0 : index
    %c0_17 = arith.constant 0 : index
    %15 = vector.load %arg6[%c0_16, %c0_17] : memref<32x128xf32, #tpu.memory_space<vmem>>, vector<32x128xf32>
    %c0_18 = arith.constant 0 : index
    %c0_19 = arith.constant 0 : index
    %16 = vector.load %arg7[%c0_18, %c0_19] : memref<4x32xf32, #tpu.memory_space<vmem>>, vector<4x32xf32>
    %17 = vector.extract_strided_slice %16 {offsets = [0, 0], sizes = [1, 32], strides = [1, 1]} : vector<4x32xf32> to vector<1x32xf32>
    %18 = vector.shape_cast %17 : vector<1x32xf32> to vector<1x32xf32>
    %19 = vector.broadcast %18 : vector<1x32xf32> to vector<2x32xf32>
    %20 = vector.extract_strided_slice %16 {offsets = [1, 0], sizes = [1, 32], strides = [1, 1]} : vector<4x32xf32> to vector<1x32xf32>
    %21 = vector.shape_cast %20 : vector<1x32xf32> to vector<1x32xf32>
    %22 = vector.broadcast %21 : vector<1x32xf32> to vector<2x32xf32>
    %23 = vector.extract_strided_slice %16 {offsets = [2, 0], sizes = [1, 32], strides = [1, 1]} : vector<4x32xf32> to vector<1x32xf32>
    %24 = vector.shape_cast %23 : vector<1x32xf32> to vector<1x32xf32>
    %25 = vector.broadcast %24 : vector<1x32xf32> to vector<2x32xf32>
    %26 = vector.extract_strided_slice %16 {offsets = [3, 0], sizes = [1, 32], strides = [1, 1]} : vector<4x32xf32> to vector<1x32xf32>
    %27 = vector.shape_cast %26 : vector<1x32xf32> to vector<1x32xf32>
    %28 = vector.broadcast %27 : vector<1x32xf32> to vector<2x32xf32>
    %c0_i32 = arith.constant 0 : i32
    %c7_i32 = arith.constant 7 : i32
    %29 = arith.subi %c7_i32, %c0_i32 : i32
    %c1_i32 = arith.constant 1 : i32
    %30 = vector.broadcast %c1_i32 : i32 to vector<2x1xi32>
    %31 = arith.subi %0, %30 : vector<2x1xi32>
    %32 = vector.broadcast %29 : i32 to vector<2x1xi32>
    %33 = arith.cmpi eq, %31, %32 : vector<2x1xi32>
    %34 = vector.shape_cast %33 : vector<2x1xi1> to vector<2x1xi1>
    %35 = vector.broadcast %34 : vector<2x1xi1> to vector<2x32xi1>
    %36 = arith.select %35, %22, %22 : vector<2x32xi1>, vector<2x32xf32>
    %37 = vector.shape_cast %33 : vector<2x1xi1> to vector<2x1xi1>
    %38 = vector.broadcast %37 : vector<2x1xi1> to vector<2x32xi1>
    %39 = arith.select %38, %28, %28 : vector<2x32xi1>, vector<2x32xf32>
    %40 = arith.index_cast %c0_i32 : i32 to index
    %c0_20 = arith.constant 0 : index
    %c0_21 = arith.constant 0 : index
    %41 = vector.load %arg12[%40, %c0_20, %c0_21] : memref<8x2x128xf32, #tpu.memory_space<vmem>>, vector<1x2x128xf32>
    %42 = vector.shape_cast %41 : vector<1x2x128xf32> to vector<2x128xf32>
    %cst_22 = arith.constant dense<0.000000e+00> : vector<2x128xf32>
    %43 = tpu.matmul %19, %14, %cst_22 {dimension_numbers = #tpu.dot_dimension_numbers<[1], [0], [0], [1], [0, 0, 1, 1], [], []>} : vector<2x32xf32>, vector<32x128xf32>, vector<2x128xf32> -> vector<2x128xf32>
    %44 = arith.addf %42, %43 : vector<2x128xf32>
    %45 = arith.index_cast %29 : i32 to index
    %c0_23 = arith.constant 0 : index
    %c0_24 = arith.constant 0 : index
    %46 = vector.load %arg13[%45, %c0_23, %c0_24] : memref<8x2x128xf32, #tpu.memory_space<vmem>>, vector<1x2x128xf32>
    %47 = vector.shape_cast %46 : vector<1x2x128xf32> to vector<2x128xf32>
    %cst_25 = arith.constant dense<0.000000e+00> : vector<2x128xf32>
    %48 = tpu.matmul %36, %15, %cst_25 {dimension_numbers = #tpu.dot_dimension_numbers<[1], [0], [0], [1], [0, 0, 1, 1], [], []>} : vector<2x32xf32>, vector<32x128xf32>, vector<2x128xf32> -> vector<2x128xf32>
    %49 = arith.addf %47, %48 : vector<2x128xf32>
    %50 = vector.extract_strided_slice %44 {offsets = [0, 0], sizes = [2, 96], strides = [1, 1]} : vector<2x128xf32> to vector<2x96xf32>
    %51 = arith.negf %50 : vector<2x96xf32>
    %52 = math.exp %51 : vector<2x96xf32>
    %cst_26 = arith.constant 1.000000e+00 : f32
    %53 = vector.broadcast %cst_26 : f32 to vector<2x96xf32>
    %54 = arith.addf %53, %52 : vector<2x96xf32>
    %55 = arith.divf %53, %54 : vector<2x96xf32>
    %56 = vector.extract_strided_slice %44 {offsets = [0, 96], sizes = [2, 32], strides = [1, 1]} : vector<2x128xf32> to vector<2x32xf32>
    %57 = math.tanh %56 : vector<2x32xf32>
    %58 = vector.extract_strided_slice %55 {offsets = [0, 32], sizes = [2, 32], strides = [1, 1]} : vector<2x96xf32> to vector<2x32xf32>
    %59 = arith.mulf %58, %25 : vector<2x32xf32>
    %60 = vector.extract_strided_slice %55 {offsets = [0, 0], sizes = [2, 32], strides = [1, 1]} : vector<2x96xf32> to vector<2x32xf32>
    %61 = arith.mulf %60, %57 : vector<2x32xf32>
    %62 = arith.addf %59, %61 : vector<2x32xf32>
    %63 = vector.extract_strided_slice %55 {offsets = [0, 64], sizes = [2, 32], strides = [1, 1]} : vector<2x96xf32> to vector<2x32xf32>
    %64 = math.tanh %62 : vector<2x32xf32>
    %65 = arith.mulf %63, %64 : vector<2x32xf32>
    %66 = vector.extract_strided_slice %49 {offsets = [0, 0], sizes = [2, 96], strides = [1, 1]} : vector<2x128xf32> to vector<2x96xf32>
    %67 = arith.negf %66 : vector<2x96xf32>
    %68 = math.exp %67 : vector<2x96xf32>
    %cst_27 = arith.constant 1.000000e+00 : f32
    %69 = vector.broadcast %cst_27 : f32 to vector<2x96xf32>
    %70 = arith.addf %69, %68 : vector<2x96xf32>
    %71 = arith.divf %69, %70 : vector<2x96xf32>
    %72 = vector.extract_strided_slice %49 {offsets = [0, 96], sizes = [2, 32], strides = [1, 1]} : vector<2x128xf32> to vector<2x32xf32>
    %73 = math.tanh %72 : vector<2x32xf32>
    %74 = vector.extract_strided_slice %71 {offsets = [0, 32], sizes = [2, 32], strides = [1, 1]} : vector<2x96xf32> to vector<2x32xf32>
    %75 = arith.mulf %74, %39 : vector<2x32xf32>
    %76 = vector.extract_strided_slice %71 {offsets = [0, 0], sizes = [2, 32], strides = [1, 1]} : vector<2x96xf32> to vector<2x32xf32>
    %77 = arith.mulf %76, %73 : vector<2x32xf32>
    %78 = arith.addf %75, %77 : vector<2x32xf32>
    %79 = vector.extract_strided_slice %71 {offsets = [0, 64], sizes = [2, 32], strides = [1, 1]} : vector<2x96xf32> to vector<2x32xf32>
    %80 = math.tanh %78 : vector<2x32xf32>
    %81 = arith.mulf %79, %80 : vector<2x32xf32>
    %82 = vector.broadcast %c0_i32 : i32 to vector<2x1xi32>
    %83 = arith.cmpi slt, %82, %0 : vector<2x1xi32>
    %84 = arith.extui %83 : vector<2x1xi1> to vector<2x1xi32>
    %85 = arith.sitofp %84 : vector<2x1xi32> to vector<2x1xf32>
    %86 = vector.broadcast %85 : vector<2x1xf32> to vector<2x32xf32>
    %87 = arith.mulf %65, %86 : vector<2x32xf32>
    %88 = arith.truncf %87 : vector<2x32xf32> to vector<2x32xbf16>
    %89 = arith.index_cast %c0_i32 : i32 to index
    %c0_28 = arith.constant 0 : index
    %c0_29 = arith.constant 0 : index
    %90 = vector.load %arg14[%89, %c0_28, %c0_29] : memref<8x2x32xbf16, #tpu.memory_space<vmem>>, vector<1x2x32xbf16>
    %91 = vector.shape_cast %90 : vector<1x2x32xbf16> to vector<2x32xbf16>
    %92 = vector.shape_cast %88 : vector<2x32xbf16> to vector<1x2x32xbf16>
    tpu.vector_store %arg14[%89, %c0_28, %c0_29], %92 {strides = array<i32>} : memref<8x2x32xbf16, #tpu.memory_space<vmem>>, vector<1x2x32xbf16>,
    %93 = vector.broadcast %29 : i32 to vector<2x1xi32>
    %94 = arith.cmpi slt, %93, %0 : vector<2x1xi32>
    %95 = arith.extui %94 : vector<2x1xi1> to vector<2x1xi32>
    %96 = arith.sitofp %95 : vector<2x1xi32> to vector<2x1xf32>
    %97 = vector.broadcast %96 : vector<2x1xf32> to vector<2x32xf32>
    %98 = arith.mulf %81, %97 : vector<2x32xf32>
    %99 = arith.truncf %98 : vector<2x32xf32> to vector<2x32xbf16>
    %100 = arith.index_cast %29 : i32 to index
    %c0_30 = arith.constant 0 : index
    %c0_31 = arith.constant 0 : index
    %101 = vector.load %arg15[%100, %c0_30, %c0_31] : memref<8x2x32xbf16, #tpu.memory_space<vmem>>, vector<1x2x32xbf16>
    %102 = vector.shape_cast %101 : vector<1x2x32xbf16> to vector<2x32xbf16>
    %103 = vector.shape_cast %99 : vector<2x32xbf16> to vector<1x2x32xbf16>
    tpu.vector_store %arg15[%100, %c0_30, %c0_31], %103 {strides = array<i32>} : memref<8x2x32xbf16, #tpu.memory_space<vmem>>, vector<1x2x32xbf16>,
    %c1_i32_32 = arith.constant 1 : i32
    %c7_i32_33 = arith.constant 7 : i32
    %104 = arith.subi %c7_i32_33, %c1_i32_32 : i32
    %c1_i32_34 = arith.constant 1 : i32
    %105 = vector.broadcast %c1_i32_34 : i32 to vector<2x1xi32>
    %106 = arith.subi %0, %105 : vector<2x1xi32>
    %107 = vector.broadcast %104 : i32 to vector<2x1xi32>
    %108 = arith.cmpi eq, %106, %107 : vector<2x1xi32>
    %109 = vector.shape_cast %108 : vector<2x1xi1> to vector<2x1xi1>
    %110 = vector.broadcast %109 : vector<2x1xi1> to vector<2x32xi1>
    %111 = arith.select %110, %22, %81 : vector<2x32xi1>, vector<2x32xf32>
    %112 = vector.shape_cast %108 : vector<2x1xi1> to vector<2x1xi1>
    %113 = vector.broadcast %112 : vector<2x1xi1> to vector<2x32xi1>
    %114 = arith.select %113, %28, %78 : vector<2x32xi1>, vector<2x32xf32>
    %115 = arith.index_cast %c1_i32_32 : i32 to index
    %c0_35 = arith.constant 0 : index
    %c0_36 = arith.constant 0 : index
    %116 = vector.load %arg12[%115, %c0_35, %c0_36] : memref<8x2x128xf32, #tpu.memory_space<vmem>>, vector<1x2x128xf32>
    %117 = vector.shape_cast %116 : vector<1x2x128xf32> to vector<2x128xf32>
    %cst_37 = arith.constant dense<0.000000e+00> : vector<2x128xf32>
    %118 = tpu.matmul %65, %14, %cst_37 {dimension_numbers = #tpu.dot_dimension_numbers<[1], [0], [0], [1], [0, 0, 1, 1], [], []>} : vector<2x32xf32>, vector<32x128xf32>, vector<2x128xf32> -> vector<2x128xf32>
    %119 = arith.addf %117, %118 : vector<2x128xf32>
    %120 = arith.index_cast %104 : i32 to index
    %c0_38 = arith.constant 0 : index
    %c0_39 = arith.constant 0 : index
    %121 = vector.load %arg13[%120, %c0_38, %c0_39] : memref<8x2x128xf32, #tpu.memory_space<vmem>>, vector<1x2x128xf32>
    %122 = vector.shape_cast %121 : vector<1x2x128xf32> to vector<2x128xf32>
    %cst_40 = arith.constant dense<0.000000e+00> : vector<2x128xf32>
    %123 = tpu.matmul %111, %15, %cst_40 {dimension_numbers = #tpu.dot_dimension_numbers<[1], [0], [0], [1], [0, 0, 1, 1], [], []>} : vector<2x32xf32>, vector<32x128xf32>, vector<2x128xf32> -> vector<2x128xf32>
    %124 = arith.addf %122, %123 : vector<2x128xf32>
    %125 = vector.extract_strided_slice %119 {offsets = [0, 0], sizes = [2, 96], strides = [1, 1]} : vector<2x128xf32> to vector<2x96xf32>
    %126 = arith.negf %125 : vector<2x96xf32>
    %127 = math.exp %126 : vector<2x96xf32>
    %cst_41 = arith.constant 1.000000e+00 : f32
    %128 = vector.broadcast %cst_41 : f32 to vector<2x96xf32>
    %129 = arith.addf %128, %127 : vector<2x96xf32>
    %130 = arith.divf %128, %129 : vector<2x96xf32>
    %131 = vector.extract_strided_slice %119 {offsets = [0, 96], sizes = [2, 32], strides = [1, 1]} : vector<2x128xf32> to vector<2x32xf32>
    %132 = math.tanh %131 : vector<2x32xf32>
    %133 = vector.extract_strided_slice %130 {offsets = [0, 32], sizes = [2, 32], strides = [1, 1]} : vector<2x96xf32> to vector<2x32xf32>
    %134 = arith.mulf %133, %62 : vector<2x32xf32>
    %135 = vector.extract_strided_slice %130 {offsets = [0, 0], sizes = [2, 32], strides = [1, 1]} : vector<2x96xf32> to vector<2x32xf32>
    %136 = arith.mulf %135, %132 : vector<2x32xf32>
    %137 = arith.addf %134, %136 : vector<2x32xf32>
    %138 = vector.extract_strided_slice %130 {offsets = [0, 64], sizes = [2, 32], strides = [1, 1]} : vector<2x96xf32> to vector<2x32xf32>
    %139 = math.tanh %137 : vector<2x32xf32>
    %140 = arith.mulf %138, %139 : vector<2x32xf32>
    %141 = vector.extract_strided_slice %124 {offsets = [0, 0], sizes = [2, 96], strides = [1, 1]} : vector<2x128xf32> to vector<2x96xf32>
    %142 = arith.negf %141 : vector<2x96xf32>
    %143 = math.exp %142 : vector<2x96xf32>
    %cst_42 = arith.constant 1.000000e+00 : f32
    %144 = vector.broadcast %cst_42 : f32 to vector<2x96xf32>
    %145 = arith.addf %144, %143 : vector<2x96xf32>
    %146 = arith.divf %144, %145 : vector<2x96xf32>
    %147 = vector.extract_strided_slice %124 {offsets = [0, 96], sizes = [2, 32], strides = [1, 1]} : vector<2x128xf32> to vector<2x32xf32>
    %148 = math.tanh %147 : vector<2x32xf32>
    %149 = vector.extract_strided_slice %146 {offsets = [0, 32], sizes = [2, 32], strides = [1, 1]} : vector<2x96xf32> to vector<2x32xf32>
    %150 = arith.mulf %149, %114 : vector<2x32xf32>
    %151 = vector.extract_strided_slice %146 {offsets = [0, 0], sizes = [2, 32], strides = [1, 1]} : vector<2x96xf32> to vector<2x32xf32>
    %152 = arith.mulf %151, %148 : vector<2x32xf32>
    %153 = arith.addf %150, %152 : vector<2x32xf32>
    %154 = vector.extract_strided_slice %146 {offsets = [0, 64], sizes = [2, 32], strides = [1, 1]} : vector<2x96xf32> to vector<2x32xf32>
    %155 = math.tanh %153 : vector<2x32xf32>
    %156 = arith.mulf %154, %155 : vector<2x32xf32>
    %157 = vector.broadcast %c1_i32_32 : i32 to vector<2x1xi32>
    %158 = arith.cmpi slt, %157, %0 : vector<2x1xi32>
    %159 = arith.extui %158 : vector<2x1xi1> to vector<2x1xi32>
    %160 = arith.sitofp %159 : vector<2x1xi32> to vector<2x1xf32>
    %161 = vector.broadcast %160 : vector<2x1xf32> to vector<2x32xf32>
    %162 = arith.mulf %140, %161 : vector<2x32xf32>
    %163 = arith.truncf %162 : vector<2x32xf32> to vector<2x32xbf16>
    %164 = arith.index_cast %c1_i32_32 : i32 to index
    %c0_43 = arith.constant 0 : index
    %c0_44 = arith.constant 0 : index
    %165 = vector.load %arg14[%164, %c0_43, %c0_44] : memref<8x2x32xbf16, #tpu.memory_space<vmem>>, vector<1x2x32xbf16>
    %166 = vector.shape_cast %165 : vector<1x2x32xbf16> to vector<2x32xbf16>
    %167 = vector.shape_cast %163 : vector<2x32xbf16> to vector<1x2x32xbf16>
    tpu.vector_store %arg14[%164, %c0_43, %c0_44], %167 {strides = array<i32>} : memref<8x2x32xbf16, #tpu.memory_space<vmem>>, vector<1x2x32xbf16>,
    %168 = vector.broadcast %104 : i32 to vector<2x1xi32>
    %169 = arith.cmpi slt, %168, %0 : vector<2x1xi32>
    %170 = arith.extui %169 : vector<2x1xi1> to vector<2x1xi32>
    %171 = arith.sitofp %170 : vector<2x1xi32> to vector<2x1xf32>
    %172 = vector.broadcast %171 : vector<2x1xf32> to vector<2x32xf32>
    %173 = arith.mulf %156, %172 : vector<2x32xf32>
    %174 = arith.truncf %173 : vector<2x32xf32> to vector<2x32xbf16>
    %175 = arith.index_cast %104 : i32 to index
    %c0_45 = arith.constant 0 : index
    %c0_46 = arith.constant 0 : index
    %176 = vector.load %arg15[%175, %c0_45, %c0_46] : memref<8x2x32xbf16, #tpu.memory_space<vmem>>, vector<1x2x32xbf16>
    %177 = vector.shape_cast %176 : vector<1x2x32xbf16> to vector<2x32xbf16>
    %178 = vector.shape_cast %174 : vector<2x32xbf16> to vector<1x2x32xbf16>
    tpu.vector_store %arg15[%175, %c0_45, %c0_46], %178 {strides = array<i32>} : memref<8x2x32xbf16, #tpu.memory_space<vmem>>, vector<1x2x32xbf16>,
    %c2_i32 = arith.constant 2 : i32
    %c7_i32_47 = arith.constant 7 : i32
    %179 = arith.subi %c7_i32_47, %c2_i32 : i32
    %c1_i32_48 = arith.constant 1 : i32
    %180 = vector.broadcast %c1_i32_48 : i32 to vector<2x1xi32>
    %181 = arith.subi %0, %180 : vector<2x1xi32>
    %182 = vector.broadcast %179 : i32 to vector<2x1xi32>
    %183 = arith.cmpi eq, %181, %182 : vector<2x1xi32>
    %184 = vector.shape_cast %183 : vector<2x1xi1> to vector<2x1xi1>
    %185 = vector.broadcast %184 : vector<2x1xi1> to vector<2x32xi1>
    %186 = arith.select %185, %22, %156 : vector<2x32xi1>, vector<2x32xf32>
    %187 = vector.shape_cast %183 : vector<2x1xi1> to vector<2x1xi1>
    %188 = vector.broadcast %187 : vector<2x1xi1> to vector<2x32xi1>
    %189 = arith.select %188, %28, %153 : vector<2x32xi1>, vector<2x32xf32>
    %190 = arith.index_cast %c2_i32 : i32 to index
    %c0_49 = arith.constant 0 : index
    %c0_50 = arith.constant 0 : index
    %191 = vector.load %arg12[%190, %c0_49, %c0_50] : memref<8x2x128xf32, #tpu.memory_space<vmem>>, vector<1x2x128xf32>
    %192 = vector.shape_cast %191 : vector<1x2x128xf32> to vector<2x128xf32>
    %cst_51 = arith.constant dense<0.000000e+00> : vector<2x128xf32>
    %193 = tpu.matmul %140, %14, %cst_51 {dimension_numbers = #tpu.dot_dimension_numbers<[1], [0], [0], [1], [0, 0, 1, 1], [], []>} : vector<2x32xf32>, vector<32x128xf32>, vector<2x128xf32> -> vector<2x128xf32>
    %194 = arith.addf %192, %193 : vector<2x128xf32>
    %195 = arith.index_cast %179 : i32 to index
    %c0_52 = arith.constant 0 : index
    %c0_53 = arith.constant 0 : index
    %196 = vector.load %arg13[%195, %c0_52, %c0_53] : memref<8x2x128xf32, #tpu.memory_space<vmem>>, vector<1x2x128xf32>
    %197 = vector.shape_cast %196 : vector<1x2x128xf32> to vector<2x128xf32>
    %cst_54 = arith.constant dense<0.000000e+00> : vector<2x128xf32>
    %198 = tpu.matmul %186, %15, %cst_54 {dimension_numbers = #tpu.dot_dimension_numbers<[1], [0], [0], [1], [0, 0, 1, 1], [], []>} : vector<2x32xf32>, vector<32x128xf32>, vector<2x128xf32> -> vector<2x128xf32>
    %199 = arith.addf %197, %198 : vector<2x128xf32>
    %200 = vector.extract_strided_slice %194 {offsets = [0, 0], sizes = [2, 96], strides = [1, 1]} : vector<2x128xf32> to vector<2x96xf32>
    %201 = arith.negf %200 : vector<2x96xf32>
    %202 = math.exp %201 : vector<2x96xf32>
    %cst_55 = arith.constant 1.000000e+00 : f32
    %203 = vector.broadcast %cst_55 : f32 to vector<2x96xf32>
    %204 = arith.addf %203, %202 : vector<2x96xf32>
    %205 = arith.divf %203, %204 : vector<2x96xf32>
    %206 = vector.extract_strided_slice %194 {offsets = [0, 96], sizes = [2, 32], strides = [1, 1]} : vector<2x128xf32> to vector<2x32xf32>
    %207 = math.tanh %206 : vector<2x32xf32>
    %208 = vector.extract_strided_slice %205 {offsets = [0, 32], sizes = [2, 32], strides = [1, 1]} : vector<2x96xf32> to vector<2x32xf32>
    %209 = arith.mulf %208, %137 : vector<2x32xf32>
    %210 = vector.extract_strided_slice %205 {offsets = [0, 0], sizes = [2, 32], strides = [1, 1]} : vector<2x96xf32> to vector<2x32xf32>
    %211 = arith.mulf %210, %207 : vector<2x32xf32>
    %212 = arith.addf %209, %211 : vector<2x32xf32>
    %213 = vector.extract_strided_slice %205 {offsets = [0, 64], sizes = [2, 32], strides = [1, 1]} : vector<2x96xf32> to vector<2x32xf32>
    %214 = math.tanh %212 : vector<2x32xf32>
    %215 = arith.mulf %213, %214 : vector<2x32xf32>
    %216 = vector.extract_strided_slice %199 {offsets = [0, 0], sizes = [2, 96], strides = [1, 1]} : vector<2x128xf32> to vector<2x96xf32>
    %217 = arith.negf %216 : vector<2x96xf32>
    %218 = math.exp %217 : vector<2x96xf32>
    %cst_56 = arith.constant 1.000000e+00 : f32
    %219 = vector.broadcast %cst_56 : f32 to vector<2x96xf32>
    %220 = arith.addf %219, %218 : vector<2x96xf32>
    %221 = arith.divf %219, %220 : vector<2x96xf32>
    %222 = vector.extract_strided_slice %199 {offsets = [0, 96], sizes = [2, 32], strides = [1, 1]} : vector<2x128xf32> to vector<2x32xf32>
    %223 = math.tanh %222 : vector<2x32xf32>
    %224 = vector.extract_strided_slice %221 {offsets = [0, 32], sizes = [2, 32], strides = [1, 1]} : vector<2x96xf32> to vector<2x32xf32>
    %225 = arith.mulf %224, %189 : vector<2x32xf32>
    %226 = vector.extract_strided_slice %221 {offsets = [0, 0], sizes = [2, 32], strides = [1, 1]} : vector<2x96xf32> to vector<2x32xf32>
    %227 = arith.mulf %226, %223 : vector<2x32xf32>
    %228 = arith.addf %225, %227 : vector<2x32xf32>
    %229 = vector.extract_strided_slice %221 {offsets = [0, 64], sizes = [2, 32], strides = [1, 1]} : vector<2x96xf32> to vector<2x32xf32>
    %230 = math.tanh %228 : vector<2x32xf32>
    %231 = arith.mulf %229, %230 : vector<2x32xf32>
    %232 = vector.broadcast %c2_i32 : i32 to vector<2x1xi32>
    %233 = arith.cmpi slt, %232, %0 : vector<2x1xi32>
    %234 = arith.extui %233 : vector<2x1xi1> to vector<2x1xi32>
    %235 = arith.sitofp %234 : vector<2x1xi32> to vector<2x1xf32>
    %236 = vector.broadcast %235 : vector<2x1xf32> to vector<2x32xf32>
    %237 = arith.mulf %215, %236 : vector<2x32xf32>
    %238 = arith.truncf %237 : vector<2x32xf32> to vector<2x32xbf16>
    %239 = arith.index_cast %c2_i32 : i32 to index
    %c0_57 = arith.constant 0 : index
    %c0_58 = arith.constant 0 : index
    %240 = vector.load %arg14[%239, %c0_57, %c0_58] : memref<8x2x32xbf16, #tpu.memory_space<vmem>>, vector<1x2x32xbf16>
    %241 = vector.shape_cast %240 : vector<1x2x32xbf16> to vector<2x32xbf16>
    %242 = vector.shape_cast %238 : vector<2x32xbf16> to vector<1x2x32xbf16>
    tpu.vector_store %arg14[%239, %c0_57, %c0_58], %242 {strides = array<i32>} : memref<8x2x32xbf16, #tpu.memory_space<vmem>>, vector<1x2x32xbf16>,
    %243 = vector.broadcast %179 : i32 to vector<2x1xi32>
    %244 = arith.cmpi slt, %243, %0 : vector<2x1xi32>
    %245 = arith.extui %244 : vector<2x1xi1> to vector<2x1xi32>
    %246 = arith.sitofp %245 : vector<2x1xi32> to vector<2x1xf32>
    %247 = vector.broadcast %246 : vector<2x1xf32> to vector<2x32xf32>
    %248 = arith.mulf %231, %247 : vector<2x32xf32>
    %249 = arith.truncf %248 : vector<2x32xf32> to vector<2x32xbf16>
    %250 = arith.index_cast %179 : i32 to index
    %c0_59 = arith.constant 0 : index
    %c0_60 = arith.constant 0 : index
    %251 = vector.load %arg15[%250, %c0_59, %c0_60] : memref<8x2x32xbf16, #tpu.memory_space<vmem>>, vector<1x2x32xbf16>
    %252 = vector.shape_cast %251 : vector<1x2x32xbf16> to vector<2x32xbf16>
    %253 = vector.shape_cast %249 : vector<2x32xbf16> to vector<1x2x32xbf16>
    tpu.vector_store %arg15[%250, %c0_59, %c0_60], %253 {strides = array<i32>} : memref<8x2x32xbf16, #tpu.memory_space<vmem>>, vector<1x2x32xbf16>,
    %c3_i32 = arith.constant 3 : i32
    %c7_i32_61 = arith.constant 7 : i32
    %254 = arith.subi %c7_i32_61, %c3_i32 : i32
    %c1_i32_62 = arith.constant 1 : i32
    %255 = vector.broadcast %c1_i32_62 : i32 to vector<2x1xi32>
    %256 = arith.subi %0, %255 : vector<2x1xi32>
    %257 = vector.broadcast %254 : i32 to vector<2x1xi32>
    %258 = arith.cmpi eq, %256, %257 : vector<2x1xi32>
    %259 = vector.shape_cast %258 : vector<2x1xi1> to vector<2x1xi1>
    %260 = vector.broadcast %259 : vector<2x1xi1> to vector<2x32xi1>
    %261 = arith.select %260, %22, %231 : vector<2x32xi1>, vector<2x32xf32>
    %262 = vector.shape_cast %258 : vector<2x1xi1> to vector<2x1xi1>
    %263 = vector.broadcast %262 : vector<2x1xi1> to vector<2x32xi1>
    %264 = arith.select %263, %28, %228 : vector<2x32xi1>, vector<2x32xf32>
    %265 = arith.index_cast %c3_i32 : i32 to index
    %c0_63 = arith.constant 0 : index
    %c0_64 = arith.constant 0 : index
    %266 = vector.load %arg12[%265, %c0_63, %c0_64] : memref<8x2x128xf32, #tpu.memory_space<vmem>>, vector<1x2x128xf32>
    %267 = vector.shape_cast %266 : vector<1x2x128xf32> to vector<2x128xf32>
    %cst_65 = arith.constant dense<0.000000e+00> : vector<2x128xf32>
    %268 = tpu.matmul %215, %14, %cst_65 {dimension_numbers = #tpu.dot_dimension_numbers<[1], [0], [0], [1], [0, 0, 1, 1], [], []>} : vector<2x32xf32>, vector<32x128xf32>, vector<2x128xf32> -> vector<2x128xf32>
    %269 = arith.addf %267, %268 : vector<2x128xf32>
    %270 = arith.index_cast %254 : i32 to index
    %c0_66 = arith.constant 0 : index
    %c0_67 = arith.constant 0 : index
    %271 = vector.load %arg13[%270, %c0_66, %c0_67] : memref<8x2x128xf32, #tpu.memory_space<vmem>>, vector<1x2x128xf32>
    %272 = vector.shape_cast %271 : vector<1x2x128xf32> to vector<2x128xf32>
    %cst_68 = arith.constant dense<0.000000e+00> : vector<2x128xf32>
    %273 = tpu.matmul %261, %15, %cst_68 {dimension_numbers = #tpu.dot_dimension_numbers<[1], [0], [0], [1], [0, 0, 1, 1], [], []>} : vector<2x32xf32>, vector<32x128xf32>, vector<2x128xf32> -> vector<2x128xf32>
    %274 = arith.addf %272, %273 : vector<2x128xf32>
    %275 = vector.extract_strided_slice %269 {offsets = [0, 0], sizes = [2, 96], strides = [1, 1]} : vector<2x128xf32> to vector<2x96xf32>
    %276 = arith.negf %275 : vector<2x96xf32>
    %277 = math.exp %276 : vector<2x96xf32>
    %cst_69 = arith.constant 1.000000e+00 : f32
    %278 = vector.broadcast %cst_69 : f32 to vector<2x96xf32>
    %279 = arith.addf %278, %277 : vector<2x96xf32>
    %280 = arith.divf %278, %279 : vector<2x96xf32>
    %281 = vector.extract_strided_slice %269 {offsets = [0, 96], sizes = [2, 32], strides = [1, 1]} : vector<2x128xf32> to vector<2x32xf32>
    %282 = math.tanh %281 : vector<2x32xf32>
    %283 = vector.extract_strided_slice %280 {offsets = [0, 32], sizes = [2, 32], strides = [1, 1]} : vector<2x96xf32> to vector<2x32xf32>
    %284 = arith.mulf %283, %212 : vector<2x32xf32>
    %285 = vector.extract_strided_slice %280 {offsets = [0, 0], sizes = [2, 32], strides = [1, 1]} : vector<2x96xf32> to vector<2x32xf32>
    %286 = arith.mulf %285, %282 : vector<2x32xf32>
    %287 = arith.addf %284, %286 : vector<2x32xf32>
    %288 = vector.extract_strided_slice %280 {offsets = [0, 64], sizes = [2, 32], strides = [1, 1]} : vector<2x96xf32> to vector<2x32xf32>
    %289 = math.tanh %287 : vector<2x32xf32>
    %290 = arith.mulf %288, %289 : vector<2x32xf32>
    %291 = vector.extract_strided_slice %274 {offsets = [0, 0], sizes = [2, 96], strides = [1, 1]} : vector<2x128xf32> to vector<2x96xf32>
    %292 = arith.negf %291 : vector<2x96xf32>
    %293 = math.exp %292 : vector<2x96xf32>
    %cst_70 = arith.constant 1.000000e+00 : f32
    %294 = vector.broadcast %cst_70 : f32 to vector<2x96xf32>
    %295 = arith.addf %294, %293 : vector<2x96xf32>
    %296 = arith.divf %294, %295 : vector<2x96xf32>
    %297 = vector.extract_strided_slice %274 {offsets = [0, 96], sizes = [2, 32], strides = [1, 1]} : vector<2x128xf32> to vector<2x32xf32>
    %298 = math.tanh %297 : vector<2x32xf32>
    %299 = vector.extract_strided_slice %296 {offsets = [0, 32], sizes = [2, 32], strides = [1, 1]} : vector<2x96xf32> to vector<2x32xf32>
    %300 = arith.mulf %299, %264 : vector<2x32xf32>
    %301 = vector.extract_strided_slice %296 {offsets = [0, 0], sizes = [2, 32], strides = [1, 1]} : vector<2x96xf32> to vector<2x32xf32>
    %302 = arith.mulf %301, %298 : vector<2x32xf32>
    %303 = arith.addf %300, %302 : vector<2x32xf32>
    %304 = vector.extract_strided_slice %296 {offsets = [0, 64], sizes = [2, 32], strides = [1, 1]} : vector<2x96xf32> to vector<2x32xf32>
    %305 = math.tanh %303 : vector<2x32xf32>
    %306 = arith.mulf %304, %305 : vector<2x32xf32>
    %307 = vector.broadcast %c3_i32 : i32 to vector<2x1xi32>
    %308 = arith.cmpi slt, %307, %0 : vector<2x1xi32>
    %309 = arith.extui %308 : vector<2x1xi1> to vector<2x1xi32>
    %310 = arith.sitofp %309 : vector<2x1xi32> to vector<2x1xf32>
    %311 = vector.broadcast %310 : vector<2x1xf32> to vector<2x32xf32>
    %312 = arith.mulf %290, %311 : vector<2x32xf32>
    %313 = arith.truncf %312 : vector<2x32xf32> to vector<2x32xbf16>
    %314 = arith.index_cast %c3_i32 : i32 to index
    %c0_71 = arith.constant 0 : index
    %c0_72 = arith.constant 0 : index
    %315 = vector.load %arg14[%314, %c0_71, %c0_72] : memref<8x2x32xbf16, #tpu.memory_space<vmem>>, vector<1x2x32xbf16>
    %316 = vector.shape_cast %315 : vector<1x2x32xbf16> to vector<2x32xbf16>
    %317 = vector.shape_cast %313 : vector<2x32xbf16> to vector<1x2x32xbf16>
    tpu.vector_store %arg14[%314, %c0_71, %c0_72], %317 {strides = array<i32>} : memref<8x2x32xbf16, #tpu.memory_space<vmem>>, vector<1x2x32xbf16>,
    %318 = vector.broadcast %254 : i32 to vector<2x1xi32>
    %319 = arith.cmpi slt, %318, %0 : vector<2x1xi32>
    %320 = arith.extui %319 : vector<2x1xi1> to vector<2x1xi32>
    %321 = arith.sitofp %320 : vector<2x1xi32> to vector<2x1xf32>
    %322 = vector.broadcast %321 : vector<2x1xf32> to vector<2x32xf32>
    %323 = arith.mulf %306, %322 : vector<2x32xf32>
    %324 = arith.truncf %323 : vector<2x32xf32> to vector<2x32xbf16>
    %325 = arith.index_cast %254 : i32 to index
    %c0_73 = arith.constant 0 : index
    %c0_74 = arith.constant 0 : index
    %326 = vector.load %arg15[%325, %c0_73, %c0_74] : memref<8x2x32xbf16, #tpu.memory_space<vmem>>, vector<1x2x32xbf16>
    %327 = vector.shape_cast %326 : vector<1x2x32xbf16> to vector<2x32xbf16>
    %328 = vector.shape_cast %324 : vector<2x32xbf16> to vector<1x2x32xbf16>
    tpu.vector_store %arg15[%325, %c0_73, %c0_74], %328 {strides = array<i32>} : memref<8x2x32xbf16, #tpu.memory_space<vmem>>, vector<1x2x32xbf16>,
    %c4_i32 = arith.constant 4 : i32
    %c7_i32_75 = arith.constant 7 : i32
    %329 = arith.subi %c7_i32_75, %c4_i32 : i32
    %c1_i32_76 = arith.constant 1 : i32
    %330 = vector.broadcast %c1_i32_76 : i32 to vector<2x1xi32>
    %331 = arith.subi %0, %330 : vector<2x1xi32>
    %332 = vector.broadcast %329 : i32 to vector<2x1xi32>
    %333 = arith.cmpi eq, %331, %332 : vector<2x1xi32>
    %334 = vector.shape_cast %333 : vector<2x1xi1> to vector<2x1xi1>
    %335 = vector.broadcast %334 : vector<2x1xi1> to vector<2x32xi1>
    %336 = arith.select %335, %22, %306 : vector<2x32xi1>, vector<2x32xf32>
    %337 = vector.shape_cast %333 : vector<2x1xi1> to vector<2x1xi1>
    %338 = vector.broadcast %337 : vector<2x1xi1> to vector<2x32xi1>
    %339 = arith.select %338, %28, %303 : vector<2x32xi1>, vector<2x32xf32>
    %340 = arith.index_cast %c4_i32 : i32 to index
    %c0_77 = arith.constant 0 : index
    %c0_78 = arith.constant 0 : index
    %341 = vector.load %arg12[%340, %c0_77, %c0_78] : memref<8x2x128xf32, #tpu.memory_space<vmem>>, vector<1x2x128xf32>
    %342 = vector.shape_cast %341 : vector<1x2x128xf32> to vector<2x128xf32>
    %cst_79 = arith.constant dense<0.000000e+00> : vector<2x128xf32>
    %343 = tpu.matmul %290, %14, %cst_79 {dimension_numbers = #tpu.dot_dimension_numbers<[1], [0], [0], [1], [0, 0, 1, 1], [], []>} : vector<2x32xf32>, vector<32x128xf32>, vector<2x128xf32> -> vector<2x128xf32>
    %344 = arith.addf %342, %343 : vector<2x128xf32>
    %345 = arith.index_cast %329 : i32 to index
    %c0_80 = arith.constant 0 : index
    %c0_81 = arith.constant 0 : index
    %346 = vector.load %arg13[%345, %c0_80, %c0_81] : memref<8x2x128xf32, #tpu.memory_space<vmem>>, vector<1x2x128xf32>
    %347 = vector.shape_cast %346 : vector<1x2x128xf32> to vector<2x128xf32>
    %cst_82 = arith.constant dense<0.000000e+00> : vector<2x128xf32>
    %348 = tpu.matmul %336, %15, %cst_82 {dimension_numbers = #tpu.dot_dimension_numbers<[1], [0], [0], [1], [0, 0, 1, 1], [], []>} : vector<2x32xf32>, vector<32x128xf32>, vector<2x128xf32> -> vector<2x128xf32>
    %349 = arith.addf %347, %348 : vector<2x128xf32>
    %350 = vector.extract_strided_slice %344 {offsets = [0, 0], sizes = [2, 96], strides = [1, 1]} : vector<2x128xf32> to vector<2x96xf32>
    %351 = arith.negf %350 : vector<2x96xf32>
    %352 = math.exp %351 : vector<2x96xf32>
    %cst_83 = arith.constant 1.000000e+00 : f32
    %353 = vector.broadcast %cst_83 : f32 to vector<2x96xf32>
    %354 = arith.addf %353, %352 : vector<2x96xf32>
    %355 = arith.divf %353, %354 : vector<2x96xf32>
    %356 = vector.extract_strided_slice %344 {offsets = [0, 96], sizes = [2, 32], strides = [1, 1]} : vector<2x128xf32> to vector<2x32xf32>
    %357 = math.tanh %356 : vector<2x32xf32>
    %358 = vector.extract_strided_slice %355 {offsets = [0, 32], sizes = [2, 32], strides = [1, 1]} : vector<2x96xf32> to vector<2x32xf32>
    %359 = arith.mulf %358, %287 : vector<2x32xf32>
    %360 = vector.extract_strided_slice %355 {offsets = [0, 0], sizes = [2, 32], strides = [1, 1]} : vector<2x96xf32> to vector<2x32xf32>
    %361 = arith.mulf %360, %357 : vector<2x32xf32>
    %362 = arith.addf %359, %361 : vector<2x32xf32>
    %363 = vector.extract_strided_slice %355 {offsets = [0, 64], sizes = [2, 32], strides = [1, 1]} : vector<2x96xf32> to vector<2x32xf32>
    %364 = math.tanh %362 : vector<2x32xf32>
    %365 = arith.mulf %363, %364 : vector<2x32xf32>
    %366 = vector.extract_strided_slice %349 {offsets = [0, 0], sizes = [2, 96], strides = [1, 1]} : vector<2x128xf32> to vector<2x96xf32>
    %367 = arith.negf %366 : vector<2x96xf32>
    %368 = math.exp %367 : vector<2x96xf32>
    %cst_84 = arith.constant 1.000000e+00 : f32
    %369 = vector.broadcast %cst_84 : f32 to vector<2x96xf32>
    %370 = arith.addf %369, %368 : vector<2x96xf32>
    %371 = arith.divf %369, %370 : vector<2x96xf32>
    %372 = vector.extract_strided_slice %349 {offsets = [0, 96], sizes = [2, 32], strides = [1, 1]} : vector<2x128xf32> to vector<2x32xf32>
    %373 = math.tanh %372 : vector<2x32xf32>
    %374 = vector.extract_strided_slice %371 {offsets = [0, 32], sizes = [2, 32], strides = [1, 1]} : vector<2x96xf32> to vector<2x32xf32>
    %375 = arith.mulf %374, %339 : vector<2x32xf32>
    %376 = vector.extract_strided_slice %371 {offsets = [0, 0], sizes = [2, 32], strides = [1, 1]} : vector<2x96xf32> to vector<2x32xf32>
    %377 = arith.mulf %376, %373 : vector<2x32xf32>
    %378 = arith.addf %375, %377 : vector<2x32xf32>
    %379 = vector.extract_strided_slice %371 {offsets = [0, 64], sizes = [2, 32], strides = [1, 1]} : vector<2x96xf32> to vector<2x32xf32>
    %380 = math.tanh %378 : vector<2x32xf32>
    %381 = arith.mulf %379, %380 : vector<2x32xf32>
    %382 = vector.broadcast %c4_i32 : i32 to vector<2x1xi32>
    %383 = arith.cmpi slt, %382, %0 : vector<2x1xi32>
    %384 = arith.extui %383 : vector<2x1xi1> to vector<2x1xi32>
    %385 = arith.sitofp %384 : vector<2x1xi32> to vector<2x1xf32>
    %386 = vector.broadcast %385 : vector<2x1xf32> to vector<2x32xf32>
    %387 = arith.mulf %365, %386 : vector<2x32xf32>
    %388 = arith.truncf %387 : vector<2x32xf32> to vector<2x32xbf16>
    %389 = arith.index_cast %c4_i32 : i32 to index
    %c0_85 = arith.constant 0 : index
    %c0_86 = arith.constant 0 : index
    %390 = vector.load %arg14[%389, %c0_85, %c0_86] : memref<8x2x32xbf16, #tpu.memory_space<vmem>>, vector<1x2x32xbf16>
    %391 = vector.shape_cast %390 : vector<1x2x32xbf16> to vector<2x32xbf16>
    %392 = vector.shape_cast %388 : vector<2x32xbf16> to vector<1x2x32xbf16>
    tpu.vector_store %arg14[%389, %c0_85, %c0_86], %392 {strides = array<i32>} : memref<8x2x32xbf16, #tpu.memory_space<vmem>>, vector<1x2x32xbf16>,
    %393 = vector.broadcast %329 : i32 to vector<2x1xi32>
    %394 = arith.cmpi slt, %393, %0 : vector<2x1xi32>
    %395 = arith.extui %394 : vector<2x1xi1> to vector<2x1xi32>
    %396 = arith.sitofp %395 : vector<2x1xi32> to vector<2x1xf32>
    %397 = vector.broadcast %396 : vector<2x1xf32> to vector<2x32xf32>
    %398 = arith.mulf %381, %397 : vector<2x32xf32>
    %399 = arith.truncf %398 : vector<2x32xf32> to vector<2x32xbf16>
    %400 = arith.index_cast %329 : i32 to index
    %c0_87 = arith.constant 0 : index
    %c0_88 = arith.constant 0 : index
    %401 = vector.load %arg15[%400, %c0_87, %c0_88] : memref<8x2x32xbf16, #tpu.memory_space<vmem>>, vector<1x2x32xbf16>
    %402 = vector.shape_cast %401 : vector<1x2x32xbf16> to vector<2x32xbf16>
    %403 = vector.shape_cast %399 : vector<2x32xbf16> to vector<1x2x32xbf16>
    tpu.vector_store %arg15[%400, %c0_87, %c0_88], %403 {strides = array<i32>} : memref<8x2x32xbf16, #tpu.memory_space<vmem>>, vector<1x2x32xbf16>,
    %c5_i32 = arith.constant 5 : i32
    %c7_i32_89 = arith.constant 7 : i32
    %404 = arith.subi %c7_i32_89, %c5_i32 : i32
    %c1_i32_90 = arith.constant 1 : i32
    %405 = vector.broadcast %c1_i32_90 : i32 to vector<2x1xi32>
    %406 = arith.subi %0, %405 : vector<2x1xi32>
    %407 = vector.broadcast %404 : i32 to vector<2x1xi32>
    %408 = arith.cmpi eq, %406, %407 : vector<2x1xi32>
    %409 = vector.shape_cast %408 : vector<2x1xi1> to vector<2x1xi1>
    %410 = vector.broadcast %409 : vector<2x1xi1> to vector<2x32xi1>
    %411 = arith.select %410, %22, %381 : vector<2x32xi1>, vector<2x32xf32>
    %412 = vector.shape_cast %408 : vector<2x1xi1> to vector<2x1xi1>
    %413 = vector.broadcast %412 : vector<2x1xi1> to vector<2x32xi1>
    %414 = arith.select %413, %28, %378 : vector<2x32xi1>, vector<2x32xf32>
    %415 = arith.index_cast %c5_i32 : i32 to index
    %c0_91 = arith.constant 0 : index
    %c0_92 = arith.constant 0 : index
    %416 = vector.load %arg12[%415, %c0_91, %c0_92] : memref<8x2x128xf32, #tpu.memory_space<vmem>>, vector<1x2x128xf32>
    %417 = vector.shape_cast %416 : vector<1x2x128xf32> to vector<2x128xf32>
    %cst_93 = arith.constant dense<0.000000e+00> : vector<2x128xf32>
    %418 = tpu.matmul %365, %14, %cst_93 {dimension_numbers = #tpu.dot_dimension_numbers<[1], [0], [0], [1], [0, 0, 1, 1], [], []>} : vector<2x32xf32>, vector<32x128xf32>, vector<2x128xf32> -> vector<2x128xf32>
    %419 = arith.addf %417, %418 : vector<2x128xf32>
    %420 = arith.index_cast %404 : i32 to index
    %c0_94 = arith.constant 0 : index
    %c0_95 = arith.constant 0 : index
    %421 = vector.load %arg13[%420, %c0_94, %c0_95] : memref<8x2x128xf32, #tpu.memory_space<vmem>>, vector<1x2x128xf32>
    %422 = vector.shape_cast %421 : vector<1x2x128xf32> to vector<2x128xf32>
    %cst_96 = arith.constant dense<0.000000e+00> : vector<2x128xf32>
    %423 = tpu.matmul %411, %15, %cst_96 {dimension_numbers = #tpu.dot_dimension_numbers<[1], [0], [0], [1], [0, 0, 1, 1], [], []>} : vector<2x32xf32>, vector<32x128xf32>, vector<2x128xf32> -> vector<2x128xf32>
    %424 = arith.addf %422, %423 : vector<2x128xf32>
    %425 = vector.extract_strided_slice %419 {offsets = [0, 0], sizes = [2, 96], strides = [1, 1]} : vector<2x128xf32> to vector<2x96xf32>
    %426 = arith.negf %425 : vector<2x96xf32>
    %427 = math.exp %426 : vector<2x96xf32>
    %cst_97 = arith.constant 1.000000e+00 : f32
    %428 = vector.broadcast %cst_97 : f32 to vector<2x96xf32>
    %429 = arith.addf %428, %427 : vector<2x96xf32>
    %430 = arith.divf %428, %429 : vector<2x96xf32>
    %431 = vector.extract_strided_slice %419 {offsets = [0, 96], sizes = [2, 32], strides = [1, 1]} : vector<2x128xf32> to vector<2x32xf32>
    %432 = math.tanh %431 : vector<2x32xf32>
    %433 = vector.extract_strided_slice %430 {offsets = [0, 32], sizes = [2, 32], strides = [1, 1]} : vector<2x96xf32> to vector<2x32xf32>
    %434 = arith.mulf %433, %362 : vector<2x32xf32>
    %435 = vector.extract_strided_slice %430 {offsets = [0, 0], sizes = [2, 32], strides = [1, 1]} : vector<2x96xf32> to vector<2x32xf32>
    %436 = arith.mulf %435, %432 : vector<2x32xf32>
    %437 = arith.addf %434, %436 : vector<2x32xf32>
    %438 = vector.extract_strided_slice %430 {offsets = [0, 64], sizes = [2, 32], strides = [1, 1]} : vector<2x96xf32> to vector<2x32xf32>
    %439 = math.tanh %437 : vector<2x32xf32>
    %440 = arith.mulf %438, %439 : vector<2x32xf32>
    %441 = vector.extract_strided_slice %424 {offsets = [0, 0], sizes = [2, 96], strides = [1, 1]} : vector<2x128xf32> to vector<2x96xf32>
    %442 = arith.negf %441 : vector<2x96xf32>
    %443 = math.exp %442 : vector<2x96xf32>
    %cst_98 = arith.constant 1.000000e+00 : f32
    %444 = vector.broadcast %cst_98 : f32 to vector<2x96xf32>
    %445 = arith.addf %444, %443 : vector<2x96xf32>
    %446 = arith.divf %444, %445 : vector<2x96xf32>
    %447 = vector.extract_strided_slice %424 {offsets = [0, 96], sizes = [2, 32], strides = [1, 1]} : vector<2x128xf32> to vector<2x32xf32>
    %448 = math.tanh %447 : vector<2x32xf32>
    %449 = vector.extract_strided_slice %446 {offsets = [0, 32], sizes = [2, 32], strides = [1, 1]} : vector<2x96xf32> to vector<2x32xf32>
    %450 = arith.mulf %449, %414 : vector<2x32xf32>
    %451 = vector.extract_strided_slice %446 {offsets = [0, 0], sizes = [2, 32], strides = [1, 1]} : vector<2x96xf32> to vector<2x32xf32>
    %452 = arith.mulf %451, %448 : vector<2x32xf32>
    %453 = arith.addf %450, %452 : vector<2x32xf32>
    %454 = vector.extract_strided_slice %446 {offsets = [0, 64], sizes = [2, 32], strides = [1, 1]} : vector<2x96xf32> to vector<2x32xf32>
    %455 = math.tanh %453 : vector<2x32xf32>
    %456 = arith.mulf %454, %455 : vector<2x32xf32>
    %457 = vector.broadcast %c5_i32 : i32 to vector<2x1xi32>
    %458 = arith.cmpi slt, %457, %0 : vector<2x1xi32>
    %459 = arith.extui %458 : vector<2x1xi1> to vector<2x1xi32>
    %460 = arith.sitofp %459 : vector<2x1xi32> to vector<2x1xf32>
    %461 = vector.broadcast %460 : vector<2x1xf32> to vector<2x32xf32>
    %462 = arith.mulf %440, %461 : vector<2x32xf32>
    %463 = arith.truncf %462 : vector<2x32xf32> to vector<2x32xbf16>
    %464 = arith.index_cast %c5_i32 : i32 to index
    %c0_99 = arith.constant 0 : index
    %c0_100 = arith.constant 0 : index
    %465 = vector.load %arg14[%464, %c0_99, %c0_100] : memref<8x2x32xbf16, #tpu.memory_space<vmem>>, vector<1x2x32xbf16>
    %466 = vector.shape_cast %465 : vector<1x2x32xbf16> to vector<2x32xbf16>
    %467 = vector.shape_cast %463 : vector<2x32xbf16> to vector<1x2x32xbf16>
    tpu.vector_store %arg14[%464, %c0_99, %c0_100], %467 {strides = array<i32>} : memref<8x2x32xbf16, #tpu.memory_space<vmem>>, vector<1x2x32xbf16>,
    %468 = vector.broadcast %404 : i32 to vector<2x1xi32>
    %469 = arith.cmpi slt, %468, %0 : vector<2x1xi32>
    %470 = arith.extui %469 : vector<2x1xi1> to vector<2x1xi32>
    %471 = arith.sitofp %470 : vector<2x1xi32> to vector<2x1xf32>
    %472 = vector.broadcast %471 : vector<2x1xf32> to vector<2x32xf32>
    %473 = arith.mulf %456, %472 : vector<2x32xf32>
    %474 = arith.truncf %473 : vector<2x32xf32> to vector<2x32xbf16>
    %475 = arith.index_cast %404 : i32 to index
    %c0_101 = arith.constant 0 : index
    %c0_102 = arith.constant 0 : index
    %476 = vector.load %arg15[%475, %c0_101, %c0_102] : memref<8x2x32xbf16, #tpu.memory_space<vmem>>, vector<1x2x32xbf16>
    %477 = vector.shape_cast %476 : vector<1x2x32xbf16> to vector<2x32xbf16>
    %478 = vector.shape_cast %474 : vector<2x32xbf16> to vector<1x2x32xbf16>
    tpu.vector_store %arg15[%475, %c0_101, %c0_102], %478 {strides = array<i32>} : memref<8x2x32xbf16, #tpu.memory_space<vmem>>, vector<1x2x32xbf16>,
    %c6_i32 = arith.constant 6 : i32
    %c7_i32_103 = arith.constant 7 : i32
    %479 = arith.subi %c7_i32_103, %c6_i32 : i32
    %c1_i32_104 = arith.constant 1 : i32
    %480 = vector.broadcast %c1_i32_104 : i32 to vector<2x1xi32>
    %481 = arith.subi %0, %480 : vector<2x1xi32>
    %482 = vector.broadcast %479 : i32 to vector<2x1xi32>
    %483 = arith.cmpi eq, %481, %482 : vector<2x1xi32>
    %484 = vector.shape_cast %483 : vector<2x1xi1> to vector<2x1xi1>
    %485 = vector.broadcast %484 : vector<2x1xi1> to vector<2x32xi1>
    %486 = arith.select %485, %22, %456 : vector<2x32xi1>, vector<2x32xf32>
    %487 = vector.shape_cast %483 : vector<2x1xi1> to vector<2x1xi1>
    %488 = vector.broadcast %487 : vector<2x1xi1> to vector<2x32xi1>
    %489 = arith.select %488, %28, %453 : vector<2x32xi1>, vector<2x32xf32>
    %490 = arith.index_cast %c6_i32 : i32 to index
    %c0_105 = arith.constant 0 : index
    %c0_106 = arith.constant 0 : index
    %491 = vector.load %arg12[%490, %c0_105, %c0_106] : memref<8x2x128xf32, #tpu.memory_space<vmem>>, vector<1x2x128xf32>
    %492 = vector.shape_cast %491 : vector<1x2x128xf32> to vector<2x128xf32>
    %cst_107 = arith.constant dense<0.000000e+00> : vector<2x128xf32>
    %493 = tpu.matmul %440, %14, %cst_107 {dimension_numbers = #tpu.dot_dimension_numbers<[1], [0], [0], [1], [0, 0, 1, 1], [], []>} : vector<2x32xf32>, vector<32x128xf32>, vector<2x128xf32> -> vector<2x128xf32>
    %494 = arith.addf %492, %493 : vector<2x128xf32>
    %495 = arith.index_cast %479 : i32 to index
    %c0_108 = arith.constant 0 : index
    %c0_109 = arith.constant 0 : index
    %496 = vector.load %arg13[%495, %c0_108, %c0_109] : memref<8x2x128xf32, #tpu.memory_space<vmem>>, vector<1x2x128xf32>
    %497 = vector.shape_cast %496 : vector<1x2x128xf32> to vector<2x128xf32>
    %cst_110 = arith.constant dense<0.000000e+00> : vector<2x128xf32>
    %498 = tpu.matmul %486, %15, %cst_110 {dimension_numbers = #tpu.dot_dimension_numbers<[1], [0], [0], [1], [0, 0, 1, 1], [], []>} : vector<2x32xf32>, vector<32x128xf32>, vector<2x128xf32> -> vector<2x128xf32>
    %499 = arith.addf %497, %498 : vector<2x128xf32>
    %500 = vector.extract_strided_slice %494 {offsets = [0, 0], sizes = [2, 96], strides = [1, 1]} : vector<2x128xf32> to vector<2x96xf32>
    %501 = arith.negf %500 : vector<2x96xf32>
    %502 = math.exp %501 : vector<2x96xf32>
    %cst_111 = arith.constant 1.000000e+00 : f32
    %503 = vector.broadcast %cst_111 : f32 to vector<2x96xf32>
    %504 = arith.addf %503, %502 : vector<2x96xf32>
    %505 = arith.divf %503, %504 : vector<2x96xf32>
    %506 = vector.extract_strided_slice %494 {offsets = [0, 96], sizes = [2, 32], strides = [1, 1]} : vector<2x128xf32> to vector<2x32xf32>
    %507 = math.tanh %506 : vector<2x32xf32>
    %508 = vector.extract_strided_slice %505 {offsets = [0, 32], sizes = [2, 32], strides = [1, 1]} : vector<2x96xf32> to vector<2x32xf32>
    %509 = arith.mulf %508, %437 : vector<2x32xf32>
    %510 = vector.extract_strided_slice %505 {offsets = [0, 0], sizes = [2, 32], strides = [1, 1]} : vector<2x96xf32> to vector<2x32xf32>
    %511 = arith.mulf %510, %507 : vector<2x32xf32>
    %512 = arith.addf %509, %511 : vector<2x32xf32>
    %513 = vector.extract_strided_slice %505 {offsets = [0, 64], sizes = [2, 32], strides = [1, 1]} : vector<2x96xf32> to vector<2x32xf32>
    %514 = math.tanh %512 : vector<2x32xf32>
    %515 = arith.mulf %513, %514 : vector<2x32xf32>
    %516 = vector.extract_strided_slice %499 {offsets = [0, 0], sizes = [2, 96], strides = [1, 1]} : vector<2x128xf32> to vector<2x96xf32>
    %517 = arith.negf %516 : vector<2x96xf32>
    %518 = math.exp %517 : vector<2x96xf32>
    %cst_112 = arith.constant 1.000000e+00 : f32
    %519 = vector.broadcast %cst_112 : f32 to vector<2x96xf32>
    %520 = arith.addf %519, %518 : vector<2x96xf32>
    %521 = arith.divf %519, %520 : vector<2x96xf32>
    %522 = vector.extract_strided_slice %499 {offsets = [0, 96], sizes = [2, 32], strides = [1, 1]} : vector<2x128xf32> to vector<2x32xf32>
    %523 = math.tanh %522 : vector<2x32xf32>
    %524 = vector.extract_strided_slice %521 {offsets = [0, 32], sizes = [2, 32], strides = [1, 1]} : vector<2x96xf32> to vector<2x32xf32>
    %525 = arith.mulf %524, %489 : vector<2x32xf32>
    %526 = vector.extract_strided_slice %521 {offsets = [0, 0], sizes = [2, 32], strides = [1, 1]} : vector<2x96xf32> to vector<2x32xf32>
    %527 = arith.mulf %526, %523 : vector<2x32xf32>
    %528 = arith.addf %525, %527 : vector<2x32xf32>
    %529 = vector.extract_strided_slice %521 {offsets = [0, 64], sizes = [2, 32], strides = [1, 1]} : vector<2x96xf32> to vector<2x32xf32>
    %530 = math.tanh %528 : vector<2x32xf32>
    %531 = arith.mulf %529, %530 : vector<2x32xf32>
    %532 = vector.broadcast %c6_i32 : i32 to vector<2x1xi32>
    %533 = arith.cmpi slt, %532, %0 : vector<2x1xi32>
    %534 = arith.extui %533 : vector<2x1xi1> to vector<2x1xi32>
    %535 = arith.sitofp %534 : vector<2x1xi32> to vector<2x1xf32>
    %536 = vector.broadcast %535 : vector<2x1xf32> to vector<2x32xf32>
    %537 = arith.mulf %515, %536 : vector<2x32xf32>
    %538 = arith.truncf %537 : vector<2x32xf32> to vector<2x32xbf16>
    %539 = arith.index_cast %c6_i32 : i32 to index
    %c0_113 = arith.constant 0 : index
    %c0_114 = arith.constant 0 : index
    %540 = vector.load %arg14[%539, %c0_113, %c0_114] : memref<8x2x32xbf16, #tpu.memory_space<vmem>>, vector<1x2x32xbf16>
    %541 = vector.shape_cast %540 : vector<1x2x32xbf16> to vector<2x32xbf16>
    %542 = vector.shape_cast %538 : vector<2x32xbf16> to vector<1x2x32xbf16>
    tpu.vector_store %arg14[%539, %c0_113, %c0_114], %542 {strides = array<i32>} : memref<8x2x32xbf16, #tpu.memory_space<vmem>>, vector<1x2x32xbf16>,
    %543 = vector.broadcast %479 : i32 to vector<2x1xi32>
    %544 = arith.cmpi slt, %543, %0 : vector<2x1xi32>
    %545 = arith.extui %544 : vector<2x1xi1> to vector<2x1xi32>
    %546 = arith.sitofp %545 : vector<2x1xi32> to vector<2x1xf32>
    %547 = vector.broadcast %546 : vector<2x1xf32> to vector<2x32xf32>
    %548 = arith.mulf %531, %547 : vector<2x32xf32>
    %549 = arith.truncf %548 : vector<2x32xf32> to vector<2x32xbf16>
    %550 = arith.index_cast %479 : i32 to index
    %c0_115 = arith.constant 0 : index
    %c0_116 = arith.constant 0 : index
    %551 = vector.load %arg15[%550, %c0_115, %c0_116] : memref<8x2x32xbf16, #tpu.memory_space<vmem>>, vector<1x2x32xbf16>
    %552 = vector.shape_cast %551 : vector<1x2x32xbf16> to vector<2x32xbf16>
    %553 = vector.shape_cast %549 : vector<2x32xbf16> to vector<1x2x32xbf16>
    tpu.vector_store %arg15[%550, %c0_115, %c0_116], %553 {strides = array<i32>} : memref<8x2x32xbf16, #tpu.memory_space<vmem>>, vector<1x2x32xbf16>,
    %c7_i32_117 = arith.constant 7 : i32
    %c7_i32_118 = arith.constant 7 : i32
    %554 = arith.subi %c7_i32_118, %c7_i32_117 : i32
    %c1_i32_119 = arith.constant 1 : i32
    %555 = vector.broadcast %c1_i32_119 : i32 to vector<2x1xi32>
    %556 = arith.subi %0, %555 : vector<2x1xi32>
    %557 = vector.broadcast %554 : i32 to vector<2x1xi32>
    %558 = arith.cmpi eq, %556, %557 : vector<2x1xi32>
    %559 = vector.shape_cast %558 : vector<2x1xi1> to vector<2x1xi1>
    %560 = vector.broadcast %559 : vector<2x1xi1> to vector<2x32xi1>
    %561 = arith.select %560, %22, %531 : vector<2x32xi1>, vector<2x32xf32>
    %562 = vector.shape_cast %558 : vector<2x1xi1> to vector<2x1xi1>
    %563 = vector.broadcast %562 : vector<2x1xi1> to vector<2x32xi1>
    %564 = arith.select %563, %28, %528 : vector<2x32xi1>, vector<2x32xf32>
    %565 = arith.index_cast %c7_i32_117 : i32 to index
    %c0_120 = arith.constant 0 : index
    %c0_121 = arith.constant 0 : index
    %566 = vector.load %arg12[%565, %c0_120, %c0_121] : memref<8x2x128xf32, #tpu.memory_space<vmem>>, vector<1x2x128xf32>
    %567 = vector.shape_cast %566 : vector<1x2x128xf32> to vector<2x128xf32>
    %cst_122 = arith.constant dense<0.000000e+00> : vector<2x128xf32>
    %568 = tpu.matmul %515, %14, %cst_122 {dimension_numbers = #tpu.dot_dimension_numbers<[1], [0], [0], [1], [0, 0, 1, 1], [], []>} : vector<2x32xf32>, vector<32x128xf32>, vector<2x128xf32> -> vector<2x128xf32>
    %569 = arith.addf %567, %568 : vector<2x128xf32>
    %570 = arith.index_cast %554 : i32 to index
    %c0_123 = arith.constant 0 : index
    %c0_124 = arith.constant 0 : index
    %571 = vector.load %arg13[%570, %c0_123, %c0_124] : memref<8x2x128xf32, #tpu.memory_space<vmem>>, vector<1x2x128xf32>
    %572 = vector.shape_cast %571 : vector<1x2x128xf32> to vector<2x128xf32>
    %cst_125 = arith.constant dense<0.000000e+00> : vector<2x128xf32>
    %573 = tpu.matmul %561, %15, %cst_125 {dimension_numbers = #tpu.dot_dimension_numbers<[1], [0], [0], [1], [0, 0, 1, 1], [], []>} : vector<2x32xf32>, vector<32x128xf32>, vector<2x128xf32> -> vector<2x128xf32>
    %574 = arith.addf %572, %573 : vector<2x128xf32>
    %575 = vector.extract_strided_slice %569 {offsets = [0, 0], sizes = [2, 96], strides = [1, 1]} : vector<2x128xf32> to vector<2x96xf32>
    %576 = arith.negf %575 : vector<2x96xf32>
    %577 = math.exp %576 : vector<2x96xf32>
    %cst_126 = arith.constant 1.000000e+00 : f32
    %578 = vector.broadcast %cst_126 : f32 to vector<2x96xf32>
    %579 = arith.addf %578, %577 : vector<2x96xf32>
    %580 = arith.divf %578, %579 : vector<2x96xf32>
    %581 = vector.extract_strided_slice %569 {offsets = [0, 96], sizes = [2, 32], strides = [1, 1]} : vector<2x128xf32> to vector<2x32xf32>
    %582 = math.tanh %581 : vector<2x32xf32>
    %583 = vector.extract_strided_slice %580 {offsets = [0, 32], sizes = [2, 32], strides = [1, 1]} : vector<2x96xf32> to vector<2x32xf32>
    %584 = arith.mulf %583, %512 : vector<2x32xf32>
    %585 = vector.extract_strided_slice %580 {offsets = [0, 0], sizes = [2, 32], strides = [1, 1]} : vector<2x96xf32> to vector<2x32xf32>
    %586 = arith.mulf %585, %582 : vector<2x32xf32>
    %587 = arith.addf %584, %586 : vector<2x32xf32>
    %588 = vector.extract_strided_slice %580 {offsets = [0, 64], sizes = [2, 32], strides = [1, 1]} : vector<2x96xf32> to vector<2x32xf32>
    %589 = math.tanh %587 : vector<2x32xf32>
    %590 = arith.mulf %588, %589 : vector<2x32xf32>
    %591 = vector.extract_strided_slice %574 {offsets = [0, 0], sizes = [2, 96], strides = [1, 1]} : vector<2x128xf32> to vector<2x96xf32>
    %592 = arith.negf %591 : vector<2x96xf32>
    %593 = math.exp %592 : vector<2x96xf32>
    %cst_127 = arith.constant 1.000000e+00 : f32
    %594 = vector.broadcast %cst_127 : f32 to vector<2x96xf32>
    %595 = arith.addf %594, %593 : vector<2x96xf32>
    %596 = arith.divf %594, %595 : vector<2x96xf32>
    %597 = vector.extract_strided_slice %574 {offsets = [0, 96], sizes = [2, 32], strides = [1, 1]} : vector<2x128xf32> to vector<2x32xf32>
    %598 = math.tanh %597 : vector<2x32xf32>
    %599 = vector.extract_strided_slice %596 {offsets = [0, 32], sizes = [2, 32], strides = [1, 1]} : vector<2x96xf32> to vector<2x32xf32>
    %600 = arith.mulf %599, %564 : vector<2x32xf32>
    %601 = vector.extract_strided_slice %596 {offsets = [0, 0], sizes = [2, 32], strides = [1, 1]} : vector<2x96xf32> to vector<2x32xf32>
    %602 = arith.mulf %601, %598 : vector<2x32xf32>
    %603 = arith.addf %600, %602 : vector<2x32xf32>
    %604 = vector.extract_strided_slice %596 {offsets = [0, 64], sizes = [2, 32], strides = [1, 1]} : vector<2x96xf32> to vector<2x32xf32>
    %605 = math.tanh %603 : vector<2x32xf32>
    %606 = arith.mulf %604, %605 : vector<2x32xf32>
    %607 = vector.broadcast %c7_i32_117 : i32 to vector<2x1xi32>
    %608 = arith.cmpi slt, %607, %0 : vector<2x1xi32>
    %609 = arith.extui %608 : vector<2x1xi1> to vector<2x1xi32>
    %610 = arith.sitofp %609 : vector<2x1xi32> to vector<2x1xf32>
    %611 = vector.broadcast %610 : vector<2x1xf32> to vector<2x32xf32>
    %612 = arith.mulf %590, %611 : vector<2x32xf32>
    %613 = arith.truncf %612 : vector<2x32xf32> to vector<2x32xbf16>
    %614 = arith.index_cast %c7_i32_117 : i32 to index
    %c0_128 = arith.constant 0 : index
    %c0_129 = arith.constant 0 : index
    %615 = vector.load %arg14[%614, %c0_128, %c0_129] : memref<8x2x32xbf16, #tpu.memory_space<vmem>>, vector<1x2x32xbf16>
    %616 = vector.shape_cast %615 : vector<1x2x32xbf16> to vector<2x32xbf16>
    %617 = vector.shape_cast %613 : vector<2x32xbf16> to vector<1x2x32xbf16>
    tpu.vector_store %arg14[%614, %c0_128, %c0_129], %617 {strides = array<i32>} : memref<8x2x32xbf16, #tpu.memory_space<vmem>>, vector<1x2x32xbf16>,
    %618 = vector.broadcast %554 : i32 to vector<2x1xi32>
    %619 = arith.cmpi slt, %618, %0 : vector<2x1xi32>
    %620 = arith.extui %619 : vector<2x1xi1> to vector<2x1xi32>
    %621 = arith.sitofp %620 : vector<2x1xi32> to vector<2x1xf32>
    %622 = vector.broadcast %621 : vector<2x1xf32> to vector<2x32xf32>
    %623 = arith.mulf %606, %622 : vector<2x32xf32>
    %624 = arith.truncf %623 : vector<2x32xf32> to vector<2x32xbf16>
    %625 = arith.index_cast %554 : i32 to index
    %c0_130 = arith.constant 0 : index
    %c0_131 = arith.constant 0 : index
    %626 = vector.load %arg15[%625, %c0_130, %c0_131] : memref<8x2x32xbf16, #tpu.memory_space<vmem>>, vector<1x2x32xbf16>
    %627 = vector.shape_cast %626 : vector<1x2x32xbf16> to vector<2x32xbf16>
    %628 = vector.shape_cast %624 : vector<2x32xbf16> to vector<1x2x32xbf16>
    tpu.vector_store %arg15[%625, %c0_130, %c0_131], %628 {strides = array<i32>} : memref<8x2x32xbf16, #tpu.memory_space<vmem>>, vector<1x2x32xbf16>,
    %c8_i32 = arith.constant 8 : i32
    %c0_132 = arith.constant 0 : index
    %c0_133 = arith.constant 0 : index
    %c0_134 = arith.constant 0 : index
    %629 = vector.load %arg14[%c0_132, %c0_133, %c0_134] : memref<8x2x32xbf16, #tpu.memory_space<vmem>>, vector<8x2x32xbf16>
    %630 = vector.shape_cast %629 : vector<8x2x32xbf16> to vector<16x32xbf16>
    %c0_135 = arith.constant 0 : index
    %c0_136 = arith.constant 0 : index
    %c0_137 = arith.constant 0 : index
    %631 = vector.load %arg15[%c0_135, %c0_136, %c0_137] : memref<8x2x32xbf16, #tpu.memory_space<vmem>>, vector<8x2x32xbf16>
    %632 = vector.shape_cast %631 : vector<8x2x32xbf16> to vector<16x32xbf16>
    %c0_138 = arith.constant 0 : index
    %c0_139 = arith.constant 0 : index
    %633 = vector.load %arg8[%c0_138, %c0_139] : memref<32x32xbf16, #tpu.memory_space<vmem>>, vector<32x32xbf16>
    %cst_140 = arith.constant dense<0.000000e+00> : vector<16x32xf32>
    %634 = tpu.matmul %630, %633, %cst_140 {dimension_numbers = #tpu.dot_dimension_numbers<[1], [0], [0], [1], [0, 0, 1, 1], [], []>} : vector<16x32xbf16>, vector<32x32xbf16>, vector<16x32xf32> -> vector<16x32xf32>
    %c0_141 = arith.constant 0 : index
    %c0_142 = arith.constant 0 : index
    %635 = vector.load %arg9[%c0_141, %c0_142] : memref<32x32xbf16, #tpu.memory_space<vmem>>, vector<32x32xbf16>
    %cst_143 = arith.constant dense<0.000000e+00> : vector<16x32xf32>
    %636 = tpu.matmul %632, %635, %cst_143 {dimension_numbers = #tpu.dot_dimension_numbers<[1], [0], [0], [1], [0, 0, 1, 1], [], []>} : vector<16x32xbf16>, vector<32x32xbf16>, vector<16x32xf32> -> vector<16x32xf32>
    %637 = arith.addf %634, %636 : vector<16x32xf32>
    %c0_144 = arith.constant 0 : index
    %c0_145 = arith.constant 0 : index
    %638 = vector.load %arg10[%c0_144, %c0_145] : memref<1x32xf32, #tpu.memory_space<vmem>>, vector<1x32xf32>
    %639 = vector.broadcast %638 : vector<1x32xf32> to vector<16x32xf32>
    %640 = arith.addf %637, %639 : vector<16x32xf32>
    %641 = vector.shape_cast %640 : vector<16x32xf32> to vector<8x2x32xf32>
    %c0_146 = arith.constant 0 : index
    %c0_147 = arith.constant 0 : index
    %c0_148 = arith.constant 0 : index
    %642 = vector.load %arg11[%c0_146, %c0_147, %c0_148] : memref<8x2x32xf32, #tpu.memory_space<vmem>>, vector<8x2x32xf32>
    tpu.vector_store %arg11[%c0_146, %c0_147, %c0_148], %641 {strides = array<i32>} : memref<8x2x32xf32, #tpu.memory_space<vmem>>, vector<8x2x32xf32>,
    return
  }
  func.func @transform_0(%arg0: i32) -> (i32, i32, i32) {
    %c0_i32 = arith.constant 0 : i32
    %c0_i32_0 = arith.constant 0 : i32
    %c0_i32_1 = arith.constant 0 : i32
    return %c0_i32, %arg0, %c0_i32_0 : i32, i32, i32
  }
  func.func @transform_1(%arg0: i32) -> (i32, i32) {
    %c0_i32 = arith.constant 0 : i32
    %c0_i32_0 = arith.constant 0 : i32
    return %arg0, %c0_i32 : i32, i32
  }
  func.func @transform_2(%arg0: i32) -> (i32, i32) {
    %c0_i32 = arith.constant 0 : i32
    %c0_i32_0 = arith.constant 0 : i32
    %c0_i32_1 = arith.constant 0 : i32
    return %c0_i32, %c0_i32_0 : i32, i32
  }
  func.func @transform_3(%arg0: i32) -> (i32, i32) {
    %c0_i32 = arith.constant 0 : i32
    %c0_i32_0 = arith.constant 0 : i32
    %c0_i32_1 = arith.constant 0 : i32
    return %c0_i32, %c0_i32_0 : i32, i32
  }
  func.func @transform_4(%arg0: i32) -> (i32, i32) {
    %c0_i32 = arith.constant 0 : i32
    %c0_i32_0 = arith.constant 0 : i32
    %c0_i32_1 = arith.constant 0 : i32
    return %c0_i32, %c0_i32_0 : i32, i32
  }
  func.func @transform_5(%arg0: i32) -> (i32, i32) {
    %c0_i32 = arith.constant 0 : i32
    %c0_i32_0 = arith.constant 0 : i32
    %c0_i32_1 = arith.constant 0 : i32
    return %c0_i32, %c0_i32_0 : i32, i32
  }
  func.func @transform_6(%arg0: i32) -> (i32, i32) {
    %c0_i32 = arith.constant 0 : i32
    %c0_i32_0 = arith.constant 0 : i32
    %c0_i32_1 = arith.constant 0 : i32
    return %c0_i32, %c0_i32_0 : i32, i32
  }
  func.func @transform_7(%arg0: i32) -> (i32, i32) {
    %c0_i32 = arith.constant 0 : i32
    %c0_i32_0 = arith.constant 0 : i32
    %c0_i32_1 = arith.constant 0 : i32
    return %c0_i32, %c0_i32_0 : i32, i32
  }
  func.func @transform_8(%arg0: i32) -> (i32, i32) {
    %c0_i32 = arith.constant 0 : i32
    %c0_i32_0 = arith.constant 0 : i32
    %c0_i32_1 = arith.constant 0 : i32
    return %c0_i32, %c0_i32_0 : i32, i32
  }
  func.func @transform_9(%arg0: i32) -> (i32, i32) {
    %c0_i32 = arith.constant 0 : i32
    %c0_i32_0 = arith.constant 0 : i32
    %c0_i32_1 = arith.constant 0 : i32
    return %c0_i32, %c0_i32_0 : i32, i32
  }
  func.func @transform_10(%arg0: i32) -> (i32, i32, i32) {
    %c0_i32 = arith.constant 0 : i32
    %c0_i32_0 = arith.constant 0 : i32
    %c0_i32_1 = arith.constant 0 : i32
    return %c0_i32, %arg0, %c0_i32_0 : i32, i32, i32
  }
}

</mosaic_0001>

<bundles_post_ra>
// kernel: tpu_custom_call.1
= control target key start
LH: loop header
LB: loop body
LE: loop exit
PB: predicated region body
PF: predicated region fallthrough
CT: control target
= control target key end

     0   :  { %15 = vsyncpa [#allocation7], 0  ;;  %s4355_s0 = inlined_call_operand.hbm [shape: f32[8,2,16], index: 0, kind: input, shape index: {}]   ;;  %s4356_s1 = inlined_call_operand.vmem [shape: s32[2,1], index: 1, kind: input, shape index: {}]   ;;  %s4357_s2 = inlined_call_operand.hbm [shape: bf16[16,256], index: 2, kind: input, shape index: {}]   ;;  %s4358_s3 = inlined_call_operand.vmem [shape: f32[1,256], index: 3, kind: input, shape index: {}]   ;;  %s4359_s4 = inlined_call_operand.hbm [shape: f32[32,128], index: 4, kind: input, shape index: {}]   ;;  %s4360_s5 = inlined_call_operand.hbm [shape: f32[32,128], index: 5, kind: input, shape index: {}]   ;;  %s4361_s6 = inlined_call_operand.hbm [shape: f32[4,32], index: 6, kind: input, shape index: {}]   ;;  %s4362_s7 = inlined_call_operand.vmem [shape: bf16[32,32], index: 7, kind: input, shape index: {}]   ;;  %s4363_s8 = inlined_call_operand.vmem [shape: bf16[32,32], index: 8, kind: input, shape index: {}]   ;;  %s4364_s9 = inlined_call_operand.vmem [shape: f32[1,32], index: 9, kind: input, shape index: {}]   ;;  %s4365_s10 = inlined_call_operand.hbm [shape: f32[8,2,32], index: 10, kind: output, shape index: {}]  }
   0x1   :  { %16 = vsyncpa [#allocation10], 0 }
   0x2   :  { %17 = vsyncpa [#allocation13], 0 }
   0x3   :  { %18 = vsyncpa [#allocation8], 0  ;;  %s3666_s13 = smov [#allocation9]   ;;  %s3526_s17 = scalar_lea.hbm %s4357_s2, 256 }
   0x4   :  { %s38_s14 = sshll.u32 %s3666_s13, 4  ;;  %p3527_p0 = scmp.ne.s32.totalorder %s4357_s2, %s3526_s17  ;;  %s39_s14 = int_to_ptr.vmem [resolvable:$true] %s38_s14 }
   0x5   :  { %p3530_p1 = scmp.lt.u32.totalorder %s3526_s17, %s4357_s2 }
   0x7   :  { %p3532_p2 = pnand %p3530_p1, %p3527_p0 }
   0x9   :  { %3535 = shalt.err (!%p3532_p2)
}
   0xa   :  { %s3536_s22 = scalar_lea.vmem %s39_s14, 256  ;;  %p3541_p4 = scmp.lt.s32.totalorder %s39_s14, %s39_s14 }
   0xb   :  { %p3537_p3 = scmp.ne.s32.totalorder %s39_s14, %s3536_s22  ;;  %p3542_p5 = scmp.lt.s32.totalorder %s3536_s22, %s3536_s22 }
   0xd   :  { %p3543_p6 = por %p3542_p5, %p3541_p4 }
   0xf   :  { %p3544_p7 = pnand %p3543_p6, %p3537_p3 }
  0x11   :  { %3547 = shalt.err (!%p3544_p7)
}
  0x12   :  { %s3667_s23 = smov 128   ;;  %s3668_s24 = smov 8  }
  0x13   :  { %44 = dma.hbm_to_vmem [thread:$0]  %s4357_s2, 256, %s39_s14, [#allocation10], %s3667_s23, %s3667_s23, %s3668_s24  }
  0x14   :  { %s3669_s27 = smov [#allocation12]   ;;  %s3670_s29 = smov [#allocation6]  }
  0x15   :  { %s64_s28 = sshll.u32 %s3669_s27, 4  ;;  %s24_s30 = sshll.u32 %s3670_s29, 4  ;;  %s65_s28 = int_to_ptr.vmem [resolvable:$true] %s64_s28  ;;  %s25_s30 = int_to_ptr.vmem [resolvable:$true] %s24_s30 }
  0x16   :  { %s3548_s13 = scalar_lea.hbm %s4360_s5, 512 }
  0x17   :  { %p3549_p8 = scmp.ne.s32.totalorder %s4360_s5, %s3548_s13  ;;  %p3552_p9 = scmp.lt.u32.totalorder %s3548_s13, %s4360_s5 }
  0x19   :  { %p3554_p10 = pnand %p3552_p9, %p3549_p8 }
  0x1b   :  { %3557 = shalt.err (!%p3554_p10)
}
  0x1c   :  { %s3558_s2 = scalar_lea.vmem %s65_s28, 512  ;;  %p3563_p12 = scmp.lt.s32.totalorder %s65_s28, %s65_s28 }
  0x1d   :  { %p3559_p11 = scmp.ne.s32.totalorder %s65_s28, %s3558_s2  ;;  %p3564_p13 = scmp.lt.s32.totalorder %s3558_s2, %s3558_s2 }
  0x1f   :  { %p3565_p0 = por %p3564_p13, %p3563_p12 }
  0x21   :  { %p3566_p1 = pnand %p3565_p0, %p3559_p11 }
  0x23   :  { %3569 = shalt.err (!%p3566_p1)
}
  0x24   :  { %70 = dma.hbm_to_vmem [thread:$0]  %s4360_s5, 512, %s65_s28, [#allocation13], %s3667_s23, %s3667_s23, %s3668_s24  }
  0x25   :  { %s3570_s22 = scalar_lea.hbm %s4355_s0, 256 }
  0x26   :  { %p3571_p2 = scmp.ne.s32.totalorder %s4355_s0, %s3570_s22  ;;  %p3574_p3 = scmp.lt.u32.totalorder %s3570_s22, %s4355_s0 }
  0x28   :  { %p3576_p4 = pnand %p3574_p3, %p3571_p2 }
  0x2a   :  { %3579 = shalt.err (!%p3576_p4)
}
  0x2b   :  { %s3580_s11 = scalar_lea.vmem %s25_s30, 256  ;;  %p3585_p6 = scmp.lt.s32.totalorder %s25_s30, %s25_s30 }
  0x2c   :  { %p3581_p5 = scmp.ne.s32.totalorder %s25_s30, %s3580_s11  ;;  %p3586_p7 = scmp.lt.s32.totalorder %s3580_s11, %s3580_s11 }
  0x2e   :  { %p3587_p8 = por %p3586_p7, %p3585_p6 }
  0x30   :  { %p3588_p9 = pnand %p3587_p8, %p3581_p5 }
  0x32   :  { %3591 = shalt.err (!%p3588_p9)
}
  0x33   :  { %s3671_s5 = smov 32   ;;  %s3672_s28 = smov 2  }
  0x34   :  { %30 = dma.hbm_to_vmem [thread:$0]  %s4355_s0, 256, %s25_s30, [#allocation7], %s3671_s5, %s3671_s5, %s3672_s28  }
  0x35   :  { %s3673_s15 = smov [#allocation11]   ;;  %s3674_s17 = smov [#allocation14]  }
  0x36   :  { %s52_s16 = sshll.u32 %s3673_s15, 4  ;;  %s77_s18 = sshll.u32 %s3674_s17, 4  ;;  %s53_s16 = int_to_ptr.vmem [resolvable:$true] %s52_s16  ;;  %s78_s18 = int_to_ptr.vmem [resolvable:$true] %s77_s18 }
  0x37   :  { %s3592_s19 = scalar_lea.hbm %s4359_s4, 512 }
  0x38   :  { %p3593_p10 = scmp.ne.s32.totalorder %s4359_s4, %s3592_s19  ;;  %p3596_p11 = scmp.lt.u32.totalorder %s3592_s19, %s4359_s4 }
  0x3a   :  { %p3598_p12 = pnand %p3596_p11, %p3593_p10 }
  0x3c   :  { %3601 = shalt.err (!%p3598_p12)
}
  0x3d   :  { %s3602_s0 = scalar_lea.vmem %s53_s16, 512  ;;  %p3607_p0 = scmp.lt.s32.totalorder %s53_s16, %s53_s16 }
  0x3e   :  { %p3603_p13 = scmp.ne.s32.totalorder %s53_s16, %s3602_s0  ;;  %p3608_p1 = scmp.lt.s32.totalorder %s3602_s0, %s3602_s0 }
  0x40   :  { %p3609_p2 = por %p3608_p1, %p3607_p0 }
  0x42   :  { %p3610_p3 = pnand %p3609_p2, %p3603_p13 }
  0x44   :  { %3613 = shalt.err (!%p3610_p3)
}
  0x45   :  { %58 = dma.hbm_to_vmem [thread:$0]  %s4359_s4, 512, %s53_s16, [#allocation10], %s3667_s23, %s3667_s23, %s3668_s24  }
  0x46   :  { %s3614_s11 = scalar_lea.hbm %s4361_s6, 64 }
  0x47   :  { %p3615_p4 = scmp.ne.s32.totalorder %s4361_s6, %s3614_s11  ;;  %p3618_p5 = scmp.lt.u32.totalorder %s3614_s11, %s4361_s6 }
  0x49   :  { %p3620_p6 = pnand %p3618_p5, %p3615_p4 }
  0x4b   :  { %3623 = shalt.err (!%p3620_p6)
}
  0x4c   :  { %s3624_s2 = scalar_lea.vmem %s78_s18, 64  ;;  %p3629_p8 = scmp.lt.s32.totalorder %s78_s18, %s78_s18 }
  0x4d   :  { %p3625_p7 = scmp.ne.s32.totalorder %s78_s18, %s3624_s2  ;;  %p3630_p9 = scmp.lt.s32.totalorder %s3624_s2, %s3624_s2 }
  0x4f   :  { %p3631_p10 = por %p3630_p9, %p3629_p8 }
  0x51   :  { %p3632_p11 = pnand %p3631_p10, %p3625_p7 }
  0x53   :  { %3635 = shalt.err (!%p3632_p11)
}
  0x54   :  { %80 = dma.hbm_to_vmem [thread:$0]  %s4361_s6, 64, %s78_s18, [#allocation13]  }
  0x55   :  { %3658 = dma.done.wait [#allocation7], 256  }
  0x56   :  { %3659 = vsyncadd [#allocation7], 4294967040 }
  0x57   :  { %3660 = dma.done.wait [#allocation10], 768  }
  0x58   :  { %3661 = vsyncadd [#allocation10], 4294966528 }
  0x59   :  { %3662 = dma.done.wait [#allocation13], 576  }
  0x5a   :  { %3663 = vsyncadd [#allocation13], 4294966720  ;;  %v124_v0 = vlaneseq  ;;  %v3675_v1 = vmov 0   ;;  %v3676_v2 = vmov 1966171168   ;;  %v3677_v4 = vmov 0.0|0.0  }
  0x5b   :  { %237 = vmatprep.mubr.bf16.mxu0 %v3675_v1  ;;  %v147_v3 = vunpack.c.l.s4 %v3676_v2  ;;  %3368 = vset.pattern.permute.xlu0 %v3675_v1  ;;  %vm3678_vm0 = vmmov 0   ;;  %v3679_v5 = vmov 0.0   ;;  %v3390_v8 = vld [vmem:[#allocation9 + $0x4] ss:$8 sps:$4 sm:$0xff]   ;;  %v3392_v11 = vld [vmem:[#allocation9] ss:$8 sps:$4 sm:$0xff]  }
  0x5c   :  { %3254 = vmatprep.subr.bf16.mxu1 %v3677_v4  ;;  %3070 = vmatprep.mubr.msk.f32.mxu1 %vm3678_vm0, %v3679_v5  ;;  %v3816_v6 = vshrl.u32 %v124_v0, 7  ;;  %v104_v12 = vld [vmem:[#allocation6] sm:$0x3]  ;;  %v105_v13 = vld [vmem:[#allocation6 + $0x2] sm:$0x3]  ;;  %v385_v26 = vld [vmem:[#allocation11 + $0x8] sm:$0xff] }
  0x5d   :  { %v148_v7 = vunpack.c.0.s8 %v147_v3  ;;  %3369 = vset.pattern.permute.xlu1 %v3675_v1  ;;  %205 = vmatprep.subr.bf16.mxu0 %v3390_v8  ;;  %v106_v14 = vld [vmem:[#allocation6 + $0x4] sm:$0x3]  ;;  %v107_v15 = vld [vmem:[#allocation6 + $0x6] sm:$0x3]  ;;  %v108_v16 = vld [vmem:[#allocation6 + $0x8] sm:$0x3]  ;;  %v2917_v17 = vpack.c.bf16 %v105_v13, %v104_v12 }
  0x5e   :  { %v407_v10 = vsub.s32 3, %v3816_v6  ;;  %206 = vmatpush1.bf16.msra.mxu0 %v3392_v11  ;;  %v109_v18 = vld [vmem:[#allocation6 + $0xa] sm:$0x3]  ;;  %v110_v19 = vld [vmem:[#allocation6 + $0xc] sm:$0x3]  ;;  %v2918_v21 = vpack.c.bf16 %v107_v15, %v106_v14  ;;  %v384_v25 = vld [vmem:[#allocation11] sm:$0xff] }
  0x5f   :  { %v3820_v9 = vsub.s32 %v148_v7, %v3816_v6  ;;  %v111_v20 = vld [vmem:[#allocation6 + $0xe] sm:$0x3]  ;;  %v2919_v22 = vpack.c.bf16 %v109_v18, %v108_v16  ;;  %v386_v27 = vld [vmem:[#allocation11 + $0x10] sm:$0xff]  ;;  %3260 = vmatprep.subr.bf16.mxu0 %v3677_v4  ;;  %v3826_v29 = vpack.c.bf16 %v385_v26, %v384_v25  ;;  %v387_v30 = vld [vmem:[#allocation11 + $0x18] sm:$0xff]  ;;  %v126_v33 = vsub.s32 0, %v3816_v6  ;;  %s3681_s18 = smov 96  }
  0x60   :  { %v2920_v23 = vpack.c.bf16 %v111_v20, %v110_v19  ;;  %v3831_v34 = vld [vmem:[#allocation14] sm:$0xf]  ;;  %v3834_v37 = vpack.c.bf16 %v387_v30, %v386_v27  ;;  %v389_v39 = vld [vmem:[#allocation12 + $0x8] sm:$0xff]  ;;  %vm201_vm1 = vcmask 130048   ;;  %vm410_vm2 = vcmask 261120   ;;  %v390_v46 = vld [vmem:[#allocation12 + $0x10] sm:$0xff] }
  0x61   :  { %v152_v24 = vrot.slane %v2917_v17, %v3820_v9  ;;  %v159_v28 = vrot.slane %v2918_v21, %v3820_v9  ;;  %v166_v31 = vrot.slane %v2919_v22, %v3820_v9  ;;  %v388_v35 = vld [vmem:[#allocation12] sm:$0xff]  ;;  %3256 = vmatpush3.bf16.msra.mxu1 %v3826_v29  ;;  %v3837_v38 = vrot.slane %v3831_v34, %v407_v10  ;;  %v391_v47 = vld [vmem:[#allocation12 + $0x18] sm:$0xff]  ;;  %v122_v51 = vld [vmem:[%s4358_s3] sm:$0x3]  ;;  %s3682_s14 = smov 64  }
  0x62   :  { %v173_v32 = vrot.slane %v2920_v23, %v3820_v9  ;;  %3257 = vmatprep.subr.bf16.mxu1 %v3677_v4  ;;  %v396_v43 = vrot.slane %v3831_v34, %v126_v33  ;;  %v3846_v44 = vpack.c.bf16 %v389_v39, %v388_v35  ;;  %v130_v48 = vsub.s32 1, %v3816_v6 }
  0x63   :  { %v174_v36 = vcombine.low %v152_v24, %v159_v28  ;;  %597 = vrot.lane.b32.xlu1 %v3837_v38, %s3671_s5  ;;  %v3852_v49 = vpack.c.bf16 %v391_v47, %v390_v46  ;;  %v3680_v52 = vmov 1983009808   ;;  %v127_v54 = vrot.slane %v122_v51, %v126_v33 }
  0x64   :  { %v175_v40 = vcombine.low %v166_v31, %v173_v32  ;;  %v3862_v50 = vrot.slane %v3831_v34, %v130_v48  ;;  %v255_v53 = vunpack.c.l.s4 %v3680_v52  ;;  %v131_v55 = vrot.slane %v122_v51, %v130_v48 }
  0x65   :  { %v182_v41 = vrot.slane %v174_v36, %v3820_v9  ;;  %3259 = vmatpush3.bf16.msra.mxu1 %v3834_v37  ;;  %v403_v51 = vsub.s32 2, %v3816_v6 }
  0x66   :  { %v189_v42 = vrot.slane %v175_v40, %v3820_v9  ;;  %3266 = vmatprep.subr.bf16.mxu1 %v3677_v4  ;;  %v256_v56 = vunpack.c.0.s8 %v255_v53 }
  0x67   :  { %v404_v53 = vrot.slane %v3831_v34, %v403_v51 }
  0x68   :  { %v190_v45 = vcombine.low %v182_v41, %v189_v42  ;;  %3071 = vmatmul.mubr.msk.f32.vlgmr.msra.gmra.mrb[0].mxu1 %vm410_vm2, %v396_v43  ;;  %v3880_v63 = vsub.s32 %v256_v56, %v3816_v6 }
  0x69   :  { %3268 = vmatpush3.bf16.msra.mxu1 %v3826_v29  ;;  %3092 = vmatprep.mubr.msk.f32.mxu1 %vm3678_vm0, %v3679_v5 }
  0x6a   :  { %2923 = vmatmul.mubr.msk.bf16.vlgmr.msra.gmra.mrb[0].mxu0 %vm201_vm1, %v190_v45  ;;  %3269 = vmatprep.subr.bf16.mxu1 %v3677_v4 }
  0x6b   :  { %3262 = vmatpush3.bf16.msra.mxu0 %v3846_v44  ;;  %3081 = vmatprep.mubr.msk.f32.mxu0 %vm3678_vm0, %v3679_v5 }
  0x6c   :  { %3263 = vmatprep.subr.bf16.mxu0 %v3677_v4 }
  0x6d   :  { %3271 = vmatpush3.bf16.msra.mxu1 %v3834_v37 }
  0x6e   :  { %3278 = vmatprep.subr.bf16.mxu1 %v3677_v4 }
  0x6f   :  { %3265 = vmatpush3.bf16.msra.mxu0 %v3852_v49 }
  0x70   :  { %3272 = vmatprep.subr.bf16.mxu0 %v3677_v4 }
  0x72   :  { %3082 = vmatmul.mubr.msk.f32.vlgmr.msra.gmra.mrb[4].mxu0 %vm410_vm2, %v3862_v50 }
  0x73   :  { %3274 = vmatpush3.bf16.msra.mxu0 %v3846_v44  ;;  %3103 = vmatprep.mubr.msk.f32.mxu0 %vm3678_vm0, %v3679_v5 }
  0x74   :  { %3275 = vmatprep.subr.bf16.mxu0 %v3677_v4 }
  0x77   :  { %3277 = vmatpush3.bf16.msra.mxu0 %v3852_v49 }
  0x78   :  { %3284 = vmatprep.subr.bf16.mxu0 %v3677_v4 }
 0x13b   :  { %v480_v58 = vpop.f32.mrb[0].mxu1 }
 0x13c   :  { %v3072_v61 = vpop.f32.mrb[1].mxu1 }
 0x13d   :  { %v239_v57 = vpop.f32.mrb[0].mxu0 }
 0x13e   :  { %v240_v59 = vadd.f32 %v239_v57, %v127_v54  ;;  %v241_v60 = vpop.f32.mrb[1].mxu0 }
 0x13f   :  { %v242_v62 = vadd.f32 %v241_v60, %v131_v55  ;;  %v243_v0 = vpop.f32.mrb[2].mxu0 }
 0x140   :  { %v244_v2 = vadd.f32 %v243_v0, %v127_v54  ;;  %v245_v3 = vpop.f32.mrb[3].mxu0 }
 0x141   :  { %v252_v7 = vcombine.low %v240_v59, %v242_v62  ;;  %v253_v8 = vcombine.high %v240_v59, %v242_v62  ;;  %v246_v10 = vadd.f32 %v245_v3, %v131_v55 }
 0x143   :  { %v260_v11 = vrot.slane %v252_v7, %v3880_v63  ;;  %v267_v12 = vrot.slane %v253_v8, %v3880_v63  ;;  %2924 = vst.sshfl [vmem:[#allocation2] sm:$0x3 pattern:$0x76325410] %v252_v7  ;;  %v270_v13 = vcombine.low %v244_v2, %v246_v10  ;;  %v271_v14 = vcombine.high %v244_v2, %v246_v10  ;;  %v598_v2 = vpop.permute.xlu1 %597 }
 0x144   :  { %2925 = vst.sshfl [vmem:[#allocation2 + $0x4] sm:$0x3 pattern:$0x76325410] %v253_v8 }
 0x145   :  { %v268_v15 = vcombine.high %v260_v11, %v260_v11  ;;  %v269_v16 = vcombine.high %v267_v12, %v267_v12  ;;  %v310_v17 = vrot.slane %v260_v11, %v3880_v63  ;;  %v326_v18 = vrot.slane %v267_v12, %v3880_v63  ;;  %2926 = vst.sshfl [vmem:[#allocation2 + $0x8] sm:$0x3 pattern:$0x76325410] %v270_v13  ;;  %v556_v19 = vpop.f32.mrb[4].mxu0 }
 0x146   :  { %2927 = vst.sshfl [vmem:[#allocation2 + $0xc] sm:$0x3 pattern:$0x76325410] %v271_v14  ;;  %v278_v20 = vrot.slane %v270_v13, %v3880_v63  ;;  %v285_v21 = vrot.slane %v271_v14, %v3880_v63  ;;  %v3083_v22 = vpop.f32.mrb[5].mxu0 }
 0x147   :  { %297 = vst [vmem:[#allocation2 + $0x2] sm:$0x3] %v268_v15  ;;  %299 = vst [vmem:[#allocation2 + $0x6] sm:$0x3] %v269_v16  ;;  %v311_v23 = vcombine.high %v310_v17, %v310_v17  ;;  %v318_v24 = vrot.slane %v268_v15, %v3880_v63  ;;  %v327_v25 = vcombine.high %v326_v18, %v326_v18  ;;  %v3906_v14 = vld [vmem:[%s4356_s1] sm:$0x3] }
 0x148   :  { %v334_v26 = vrot.slane %v269_v16, %v3880_v63  ;;  %v286_v27 = vcombine.high %v278_v20, %v278_v20  ;;  %v287_v28 = vcombine.high %v285_v21, %v285_v21  ;;  %v342_v30 = vrot.slane %v278_v20, %v3880_v63 }
 0x149   :  { %v358_v31 = vrot.slane %v285_v21, %v3880_v63  ;;  %v319_v32 = vcombine.high %v318_v24, %v318_v24  ;;  %376 = vst [vmem:[#allocation3] sm:$0x3] %v311_v23  ;;  %378 = vst [vmem:[#allocation3 + $0x4] sm:$0x3] %v327_v25  ;;  %v3910_v15 = vadd.s32 4294967295, %v3906_v14 }
 0x14a   :  { %v335_v33 = vcombine.high %v334_v26, %v334_v26  ;;  %301 = vst [vmem:[#allocation2 + $0xa] sm:$0x3] %v286_v27  ;;  %303 = vst [vmem:[#allocation2 + $0xe] sm:$0x3] %v287_v28  ;;  %v343_v35 = vcombine.high %v342_v30, %v342_v30  ;;  %v350_v36 = vrot.slane %v286_v27, %v3880_v63  ;;  %v409_v43 = vld [vmem:[#allocation2] sm:$0x3] }
 0x14b   :  { %v359_v39 = vcombine.high %v358_v31, %v358_v31  ;;  %v366_v40 = vrot.slane %v287_v28, %v3880_v63  ;;  %377 = vst [vmem:[#allocation3 + $0x2] sm:$0x3] %v319_v32  ;;  %v484_v47 = vadd.f32 %v480_v58, %v409_v43  ;;  %vm678_vm3 = vcmp.eq.s32.totalorder %v3910_v15, 6 }
 0x14c   :  { %379 = vst [vmem:[#allocation3 + $0x6] sm:$0x3] %v335_v33  ;;  %v351_v41 = vcombine.high %v350_v36, %v350_v36  ;;  %380 = vst [vmem:[#allocation3 + $0x8] sm:$0x3] %v343_v35  ;;  %v679_v17 = vsel %vm678_vm3, 1, %v3675_v1  ;;  %vm960_vm5 = vcmp.eq.s32.totalorder %v3910_v15, 5 }
 0x14d   :  { %v367_v42 = vcombine.high %v366_v40, %v366_v40  ;;  %382 = vst [vmem:[#allocation3 + $0xc] sm:$0x3] %v359_v39  ;;  %v2930_v55 = vmul.f32 -1.442695, %v484_v47  ;;  %vm1242_vm7 = vcmp.eq.s32.totalorder %v3910_v15, 4  ;;  %vm1524_vm9 = vcmp.eq.s32.totalorder %v3910_v15, 3 }
 0x14e   :  { %381 = vst [vmem:[#allocation3 + $0xa] sm:$0x3] %v351_v41  ;;  %v695_v32 = vld [vmem:[#allocation2 + $0x2] sm:$0x3]  ;;  %vm1790_vm11 = vcmp.eq.s32.totalorder %v3910_v15, 2  ;;  %vm2056_vm13 = vcmp.eq.s32.totalorder %v3910_v15, 1 }
 0x14f   :  { %383 = vst [vmem:[#allocation3 + $0xe] sm:$0x3] %v367_v42  ;;  %vm2322_vm15 = vcmp.eq.s32.totalorder %v3910_v15, 0  ;;  %vm647_vm3 = vcmp.gt.s32.totalorder %v3906_v14, 7 }
 0x154   :  { %v773_v27 = vld [vmem:[#allocation3 + $0xc] sm:$0x3] }
 0x156   :  { %v486_v45 = vld [vmem:[#allocation3 + $0xe] sm:$0x3] }
 0x157   :  { %v560_v46 = vadd.f32 %v556_v19, %v486_v45 }
 0x159   :  { %3397 = vtanh.f32 %v560_v46  ;;  %v2931_v54 = vmul.f32 -1.442695, %v560_v46 }
 0x15a   :  { %3399 = vtanh.f32 %v484_v47 }
 0x15b   :  { %3401 = vpow2.f32 %v2931_v54 }
 0x15c   :  { %3403 = vpow2.f32 %v2930_v55 }
 0x163   :  { %v3398_v48 = vpop.eup %3397 }
 0x164   :  { %602 = vrot.lane.b32.xlu0 %v3398_v48, %s3671_s5  ;;  %v3400_v52 = vpop.eup %3399 }
 0x165   :  { %v3402_v56 = vpop.eup %3401 }
 0x166   :  { %v592_v57 = vadd.f32 1.0, %v3402_v56  ;;  %v3404_v58 = vpop.eup %3403 }
 0x167   :  { %v564_v59 = vadd.f32 1.0, %v3404_v58 }
 0x168   :  { %574 = vrot.lane.b32.xlu0 %v3400_v52, %s3671_s5  ;;  %3405 = vrcp.f32 %v592_v57 }
 0x169   :  { %3407 = vrcp.f32 %v564_v59 }
 0x16c   :  { %569 = vrot.lane.b32.xlu0 %v404_v53, %s3671_s5 }
 0x172   :  { %v3406_v60 = vpop.eup %3405 }
 0x173   :  { %v3408_v62 = vpop.eup %3407  ;;  %v600_v3 = vmul.f32 %v3406_v60, %v598_v2  ;;  %v961_v2 = vsel %vm960_vm5, 1, %v3675_v1 }
 0x1d6   :  { %v603_v61 = vpop.permute.xlu0 %602 }
 0x1d7   :  { %v605_v6 = vmul.f32 %v3406_v60, %v603_v61 }
 0x1d9   :  { %607 = vrot.lane.b32.xlu1 %v605_v6, %s3671_s5 }
 0x1da   :  { %v575_v0 = vpop.permute.xlu0 %574 }
 0x1db   :  { %v577_v34 = vmul.f32 %v3408_v62, %v575_v0 }
 0x1dd   :  { %579 = vrot.lane.b32.xlu1 %v577_v34, %s3671_s5 }
 0x1de   :  { %v570_v7 = vpop.permute.xlu0 %569 }
 0x1df   :  { %v572_v11 = vmul.f32 %v3408_v62, %v570_v7 }
 0x24b   :  { %v608_v8 = vpop.permute.xlu1 %607 }
 0x24c   :  { %v610_v10 = vadd.f32 %v608_v8, %v600_v3 }
 0x24e   :  { %3409 = vtanh.f32 %v610_v10 }
 0x24f   :  { %v580_v12 = vpop.permute.xlu1 %579 }
 0x250   :  { %v3901_v13 = vadd.f32 %v580_v12, %v572_v11 }
 0x252   :  { %3411 = vtanh.f32 %v3901_v13 }
 0x258   :  { %v3410_v16 = vpop.eup %3409 }
 0x259   :  { %613 = vrot.lane.b32.xlu0 %v3410_v16, %s3671_s5 }
 0x25c   :  { %v3412_v18 = vpop.eup %3411 }
 0x25d   :  { %585 = vrot.lane.b32.xlu1 %v3412_v18, %s3671_s5  ;;  %681 = vperm.xlu0 %3368, %v679_v17   ;;  %v1055_v18 = vld [vmem:[#allocation3 + $0xa] sm:$0x3] }
 0x261   :  { %690 = vrot.lane.b32.xlu0 %v610_v10, %s3681_s18 }
 0x2cb   :  { %v614_v19 = vpop.permute.xlu0 %613 }
 0x2cc   :  { %v3917_v20 = vmul.f32 %v3406_v60, %v614_v19 }
 0x2ce   :  { %685 = vrot.lane.b32.xlu1 %v3917_v20, %s3682_s14 }
 0x2cf   :  { %v586_v21 = vpop.permute.xlu1 %585 }
 0x2d0   :  { %v3921_v22 = vmul.f32 %v3408_v62, %v586_v21 }
 0x2d2   :  { %697 = vrot.lane.b32.xlu1 %v3921_v22, %s3682_s14 }
 0x2dc   :  { %v682_v23 = vpop.permute.xlu0 %681 }
 0x2dd   :  { %vm683_vm4 = vcmp.eq.s32.totalorder %v682_v23, 1 }
 0x2e0   :  { %v691_v40 = vpop.permute.xlu0 %690 }
 0x2e1   :  { %v693_v42 = vsel %vm683_vm4, %v3837_v38, %v691_v40 }
 0x340   :  { %v686_v24 = vpop.permute.xlu1 %685 }
 0x341   :  { %v688_v25 = vsel %vm683_vm4, %v3862_v50, %v686_v24  ;;  %v977_v24 = vld [vmem:[#allocation2 + $0x4] sm:$0x3]  ;;  %vm900_vm4 = vcmp.gt.s32.totalorder %v3906_v14, 1 }
 0x342   :  { %3104 = vmatmul.mubr.msk.f32.vlgmr.msra.gmra.mrb[6].mxu0 %vm410_vm2, %v688_v25 }
 0x343   :  { %3286 = vmatpush3.bf16.msra.mxu0 %v3846_v44  ;;  %3125 = vmatprep.mubr.msk.f32.mxu0 %vm3678_vm0, %v3679_v5 }
 0x344   :  { %v698_v26 = vpop.permute.xlu1 %697  ;;  %3287 = vmatprep.subr.bf16.mxu0 %v3677_v4 }
 0x345   :  { %3093 = vmatmul.mubr.msk.f32.vlgmr.msra.gmra.mrb[2].mxu1 %vm410_vm2, %v698_v26 }
 0x346   :  { %3280 = vmatpush3.bf16.msra.mxu1 %v3826_v29  ;;  %3114 = vmatprep.mubr.msk.f32.mxu1 %vm3678_vm0, %v3679_v5 }
 0x347   :  { %3289 = vmatpush3.bf16.msra.mxu0 %v3852_v49  ;;  %3281 = vmatprep.subr.bf16.mxu1 %v3677_v4 }
 0x348   :  { %3296 = vmatprep.subr.bf16.mxu0 %v3677_v4 }
 0x34a   :  { %3283 = vmatpush3.bf16.msra.mxu1 %v3834_v37 }
 0x34b   :  { %3290 = vmatprep.subr.bf16.mxu1 %v3677_v4 }
 0x415   :  { %v843_v28 = vpop.f32.mrb[6].mxu0 }
 0x416   :  { %v847_v30 = vadd.f32 %v843_v28, %v773_v27  ;;  %v3105_v31 = vpop.f32.mrb[7].mxu0 }
 0x418   :  { %3413 = vtanh.f32 %v847_v30  ;;  %v767_v33 = vpop.f32.mrb[2].mxu1  ;;  %v2938_v43 = vmul.f32 -1.442695, %v847_v30 }
 0x419   :  { %v771_v35 = vadd.f32 %v767_v33, %v695_v32  ;;  %v3094_v36 = vpop.f32.mrb[3].mxu1 }
 0x41b   :  { %3415 = vtanh.f32 %v771_v35  ;;  %v2937_v45 = vmul.f32 -1.442695, %v771_v35 }
 0x41c   :  { %3417 = vpow2.f32 %v2938_v43 }
 0x41d   :  { %3419 = vpow2.f32 %v2937_v45 }
 0x422   :  { %v3414_v39 = vpop.eup %3413 }
 0x423   :  { %885 = vrot.lane.b32.xlu1 %v3414_v39, %s3671_s5 }
 0x425   :  { %v3416_v41 = vpop.eup %3415 }
 0x426   :  { %857 = vrot.lane.b32.xlu0 %v3416_v41, %s3671_s5  ;;  %v3418_v46 = vpop.eup %3417 }
 0x427   :  { %880 = vrot.lane.b32.xlu1 %v693_v42, %s3671_s5  ;;  %v3420_v47 = vpop.eup %3419  ;;  %v875_v48 = vadd.f32 1.0, %v3418_v46 }
 0x428   :  { %v851_v51 = vadd.f32 1.0, %v3420_v47 }
 0x429   :  { %3421 = vrcp.f32 %v875_v48 }
 0x42a   :  { %3423 = vrcp.f32 %v851_v51 }
 0x433   :  { %v3422_v52 = vpop.eup %3421 }
 0x434   :  { %v3424_v55 = vpop.eup %3423 }
 0x435   :  { %v855_v6 = vmul.f32 %v3424_v55, %v3901_v13 }
 0x495   :  { %v886_v53 = vpop.permute.xlu1 %885 }
 0x496   :  { %v888_v54 = vmul.f32 %v3422_v52, %v886_v53 }
 0x498   :  { %890 = vrot.lane.b32.xlu0 %v888_v54, %s3671_s5  ;;  %v858_v56 = vpop.permute.xlu0 %857 }
 0x499   :  { %v860_v57 = vmul.f32 %v3424_v55, %v858_v56  ;;  %v881_v58 = vpop.permute.xlu1 %880 }
 0x49a   :  { %v883_v59 = vmul.f32 %v3422_v52, %v881_v58 }
 0x49b   :  { %862 = vrot.lane.b32.xlu1 %v860_v57, %s3671_s5 }
 0x50a   :  { %v891_v60 = vpop.permute.xlu0 %890 }
 0x50b   :  { %v893_v61 = vadd.f32 %v891_v60, %v883_v59  ;;  %v1243_v59 = vsel %vm1242_vm7, 1, %v3675_v1 }
 0x50d   :  { %3425 = vtanh.f32 %v893_v61  ;;  %v863_v62 = vpop.permute.xlu1 %862 }
 0x50e   :  { %v3949_v0 = vadd.f32 %v863_v62, %v855_v6 }
 0x510   :  { %3427 = vtanh.f32 %v3949_v0 }
 0x517   :  { %v3426_v34 = vpop.eup %3425 }
 0x518   :  { %896 = vrot.lane.b32.xlu0 %v3426_v34, %s3671_s5 }
 0x51a   :  { %v3428_v3 = vpop.eup %3427 }
 0x51b   :  { %868 = vrot.lane.b32.xlu1 %v3428_v3, %s3671_s5 }
 0x51c   :  { %963 = vperm.xlu0 %3368, %v961_v2  }
 0x58a   :  { %v897_v7 = vpop.permute.xlu0 %896 }
 0x58b   :  { %v3956_v8 = vmul.f32 %v3422_v52, %v897_v7 }
 0x58d   :  { %v869_v10 = vpop.permute.xlu1 %868  ;;  %967 = vrot.lane.b32.xlu1 %v3956_v8, %s3682_s14 }
 0x58e   :  { %v3960_v11 = vmul.f32 %v3424_v55, %v869_v10  ;;  %v1337_v10 = vld [vmem:[#allocation3 + $0x8] sm:$0x3] }
 0x590   :  { %979 = vrot.lane.b32.xlu0 %v3960_v11, %s3682_s14 }
 0x591   :  { %972 = vrot.lane.b32.xlu1 %v893_v61, %s3681_s18 }
 0x59b   :  { %v964_v12 = vpop.permute.xlu0 %963 }
 0x59c   :  { %vm965_vm6 = vcmp.eq.s32.totalorder %v964_v12, 1 }
 0x5ff   :  { %v968_v13 = vpop.permute.xlu1 %967 }
 0x600   :  { %v970_v16 = vsel %vm965_vm6, %v3862_v50, %v968_v13 }
 0x601   :  { %3126 = vmatmul.mubr.msk.f32.vlgmr.msra.gmra.mrb[8].mxu0 %vm410_vm2, %v970_v16 }
 0x602   :  { %v980_v17 = vpop.permute.xlu0 %979  ;;  %3298 = vmatpush3.bf16.msra.mxu0 %v3846_v44  ;;  %3147 = vmatprep.mubr.msk.f32.mxu0 %vm3678_vm0, %v3679_v5 }
 0x603   :  { %3115 = vmatmul.mubr.msk.f32.vlgmr.msra.gmra.mrb[4].mxu1 %vm410_vm2, %v980_v17  ;;  %3299 = vmatprep.subr.bf16.mxu0 %v3677_v4  ;;  %v973_v30 = vpop.permute.xlu1 %972  ;;  %v1259_v17 = vld [vmem:[#allocation2 + $0x6] sm:$0x3] }
 0x604   :  { %3292 = vmatpush3.bf16.msra.mxu1 %v3826_v29  ;;  %3136 = vmatprep.mubr.msk.f32.mxu1 %vm3678_vm0, %v3679_v5  ;;  %v975_v32 = vsel %vm965_vm6, %v3837_v38, %v973_v30 }
 0x605   :  { %3293 = vmatprep.subr.bf16.mxu1 %v3677_v4 }
 0x606   :  { %3301 = vmatpush3.bf16.msra.mxu0 %v3852_v49 }
 0x607   :  { %3308 = vmatprep.subr.bf16.mxu0 %v3677_v4 }
 0x608   :  { %3295 = vmatpush3.bf16.msra.mxu1 %v3834_v37 }
 0x609   :  { %3302 = vmatprep.subr.bf16.mxu1 %v3677_v4 }
 0x6d4   :  { %v1125_v19 = vpop.f32.mrb[8].mxu0 }
 0x6d5   :  { %v1129_v21 = vadd.f32 %v1125_v19, %v1055_v18  ;;  %v3127_v23 = vpop.f32.mrb[9].mxu0 }
 0x6d6   :  { %v1049_v25 = vpop.f32.mrb[4].mxu1 }
 0x6d7   :  { %3429 = vtanh.f32 %v1129_v21  ;;  %v1053_v26 = vadd.f32 %v1049_v25, %v977_v24  ;;  %v3116_v27 = vpop.f32.mrb[5].mxu1  ;;  %v2944_v33 = vmul.f32 -1.442695, %v1129_v21 }
 0x6d9   :  { %3431 = vtanh.f32 %v1053_v26  ;;  %v2943_v35 = vmul.f32 -1.442695, %v1053_v26 }
 0x6da   :  { %3433 = vpow2.f32 %v2944_v33 }
 0x6db   :  { %3435 = vpow2.f32 %v2943_v35 }
 0x6e1   :  { %v3430_v28 = vpop.eup %3429 }
 0x6e2   :  { %1167 = vrot.lane.b32.xlu0 %v3430_v28, %s3671_s5 }
 0x6e3   :  { %v3432_v31 = vpop.eup %3431 }
 0x6e4   :  { %1139 = vrot.lane.b32.xlu1 %v3432_v31, %s3671_s5  ;;  %v3434_v36 = vpop.eup %3433 }
 0x6e5   :  { %v3436_v39 = vpop.eup %3435  ;;  %v1157_v40 = vadd.f32 1.0, %v3434_v36 }
 0x6e6   :  { %1162 = vrot.lane.b32.xlu0 %v975_v32, %s3671_s5  ;;  %v1133_v41 = vadd.f32 1.0, %v3436_v39 }
 0x6e7   :  { %3437 = vrcp.f32 %v1157_v40 }
 0x6e8   :  { %3439 = vrcp.f32 %v1133_v41 }
 0x6f1   :  { %v3438_v42 = vpop.eup %3437 }
 0x6f2   :  { %v3440_v46 = vpop.eup %3439 }
 0x6f3   :  { %v1137_v55 = vmul.f32 %v3440_v46, %v3949_v0 }
 0x754   :  { %v1168_v43 = vpop.permute.xlu0 %1167 }
 0x755   :  { %v1170_v45 = vmul.f32 %v3438_v42, %v1168_v43 }
 0x756   :  { %v1140_v47 = vpop.permute.xlu1 %1139 }
 0x757   :  { %1172 = vrot.lane.b32.xlu1 %v1170_v45, %s3671_s5  ;;  %v1142_v48 = vmul.f32 %v3440_v46, %v1140_v47 }
 0x758   :  { %v1163_v51 = vpop.permute.xlu0 %1162 }
 0x759   :  { %1144 = vrot.lane.b32.xlu0 %v1142_v48, %s3671_s5  ;;  %v1165_v52 = vmul.f32 %v3438_v42, %v1163_v51 }
 0x7c9   :  { %v1173_v53 = vpop.permute.xlu1 %1172 }
 0x7ca   :  { %v1175_v54 = vadd.f32 %v1173_v53, %v1165_v52 }
 0x7cb   :  { %v1145_v56 = vpop.permute.xlu0 %1144 }
 0x7cc   :  { %3441 = vtanh.f32 %v1175_v54  ;;  %v3989_v57 = vadd.f32 %v1145_v56, %v1137_v55 }
 0x7ce   :  { %3443 = vtanh.f32 %v3989_v57 }
 0x7d6   :  { %v3442_v58 = vpop.eup %3441 }
 0x7d7   :  { %1178 = vrot.lane.b32.xlu1 %v3442_v58, %s3671_s5 }
 0x7d8   :  { %v3444_v60 = vpop.eup %3443 }
 0x7d9   :  { %1150 = vrot.lane.b32.xlu0 %v3444_v60, %s3671_s5 }
 0x7db   :  { %1245 = vperm.xlu1 %3369, %v1243_v59  }
 0x849   :  { %v1179_v61 = vpop.permute.xlu1 %1178 }
 0x84a   :  { %v3996_v6 = vmul.f32 %v3438_v42, %v1179_v61 }
 0x84b   :  { %v1151_v62 = vpop.permute.xlu0 %1150 }
 0x84c   :  { %1249 = vrot.lane.b32.xlu0 %v3996_v6, %s3682_s14  ;;  %v4000_v0 = vmul.f32 %v3440_v46, %v1151_v62 }
 0x84e   :  { %1261 = vrot.lane.b32.xlu1 %v4000_v0, %s3682_s14 }
 0x850   :  { %1254 = vrot.lane.b32.xlu0 %v1175_v54, %s3681_s18  ;;  %v1525_v54 = vsel %vm1524_vm9, 1, %v3675_v1 }
 0x85a   :  { %v1246_v34 = vpop.permute.xlu1 %1245 }
 0x85b   :  { %vm1247_vm8 = vcmp.eq.s32.totalorder %v1246_v34, 1 }
 0x8be   :  { %v1250_v2 = vpop.permute.xlu0 %1249 }
 0x8bf   :  { %v1252_v3 = vsel %vm1247_vm8, %v3862_v50, %v1250_v2  ;;  %v1619_v2 = vld [vmem:[#allocation3 + $0x6] sm:$0x3] }
 0x8c0   :  { %3148 = vmatmul.mubr.msk.f32.vlgmr.msra.gmra.mrb[10].mxu0 %vm410_vm2, %v1252_v3  ;;  %v1262_v7 = vpop.permute.xlu1 %1261 }
 0x8c1   :  { %3310 = vmatpush3.bf16.msra.mxu0 %v3846_v44  ;;  %3169 = vmatprep.mubr.msk.f32.mxu0 %vm3678_vm0, %v3679_v5 }
 0x8c2   :  { %3137 = vmatmul.mubr.msk.f32.vlgmr.msra.gmra.mrb[6].mxu1 %vm410_vm2, %v1262_v7  ;;  %3311 = vmatprep.subr.bf16.mxu0 %v3677_v4  ;;  %v1255_v24 = vpop.permute.xlu0 %1254 }
 0x8c3   :  { %3304 = vmatpush3.bf16.msra.mxu1 %v3826_v29  ;;  %3158 = vmatprep.mubr.msk.f32.mxu1 %vm3678_vm0, %v3679_v5  ;;  %v1257_v26 = vsel %vm1247_vm8, %v3837_v38, %v1255_v24 }
 0x8c4   :  { %3305 = vmatprep.subr.bf16.mxu1 %v3677_v4 }
 0x8c5   :  { %3313 = vmatpush3.bf16.msra.mxu0 %v3852_v49 }
 0x8c6   :  { %3320 = vmatprep.subr.bf16.mxu0 %v3677_v4 }
 0x8c7   :  { %3307 = vmatpush3.bf16.msra.mxu1 %v3834_v37 }
 0x8c8   :  { %3314 = vmatprep.subr.bf16.mxu1 %v3677_v4 }
 0x993   :  { %v1407_v12 = vpop.f32.mrb[10].mxu0 }
 0x994   :  { %v1411_v13 = vadd.f32 %v1407_v12, %v1337_v10  ;;  %v3149_v16 = vpop.f32.mrb[11].mxu0  ;;  %v1541_v12 = vld [vmem:[#allocation2 + $0x8] sm:$0x3] }
 0x995   :  { %v1331_v18 = vpop.f32.mrb[6].mxu1 }
 0x996   :  { %3445 = vtanh.f32 %v1411_v13  ;;  %v1335_v19 = vadd.f32 %v1331_v18, %v1259_v17  ;;  %v3138_v21 = vpop.f32.mrb[7].mxu1  ;;  %v2950_v27 = vmul.f32 -1.442695, %v1411_v13 }
 0x998   :  { %3447 = vtanh.f32 %v1335_v19  ;;  %v2949_v28 = vmul.f32 -1.442695, %v1335_v19 }
 0x999   :  { %3449 = vpow2.f32 %v2950_v27 }
 0x99a   :  { %3451 = vpow2.f32 %v2949_v28 }
 0x9a0   :  { %v3446_v23 = vpop.eup %3445 }
 0x9a1   :  { %1449 = vrot.lane.b32.xlu1 %v3446_v23, %s3671_s5 }
 0x9a2   :  { %v3448_v25 = vpop.eup %3447 }
 0x9a3   :  { %1421 = vrot.lane.b32.xlu0 %v3448_v25, %s3671_s5  ;;  %v3450_v30 = vpop.eup %3449 }
 0x9a4   :  { %v3452_v31 = vpop.eup %3451  ;;  %v1439_v32 = vadd.f32 1.0, %v3450_v30 }
 0x9a5   :  { %1444 = vrot.lane.b32.xlu1 %v1257_v26, %s3671_s5  ;;  %v1415_v33 = vadd.f32 1.0, %v3452_v31 }
 0x9a6   :  { %3453 = vrcp.f32 %v1439_v32 }
 0x9a7   :  { %3455 = vrcp.f32 %v1415_v33 }
 0x9b0   :  { %v3454_v35 = vpop.eup %3453 }
 0x9b1   :  { %v3456_v40 = vpop.eup %3455 }
 0x9b2   :  { %v1419_v48 = vmul.f32 %v3456_v40, %v3989_v57 }
 0xa13   :  { %v1450_v36 = vpop.permute.xlu1 %1449 }
 0xa14   :  { %v1452_v39 = vmul.f32 %v3454_v35, %v1450_v36 }
 0xa15   :  { %v1422_v41 = vpop.permute.xlu0 %1421 }
 0xa16   :  { %1454 = vrot.lane.b32.xlu0 %v1452_v39, %s3671_s5  ;;  %v1424_v42 = vmul.f32 %v3456_v40, %v1422_v41 }
 0xa17   :  { %v1445_v43 = vpop.permute.xlu1 %1444 }
 0xa18   :  { %1426 = vrot.lane.b32.xlu1 %v1424_v42, %s3671_s5  ;;  %v1447_v45 = vmul.f32 %v3454_v35, %v1445_v43 }
 0xa88   :  { %v1455_v46 = vpop.permute.xlu0 %1454 }
 0xa89   :  { %v1457_v47 = vadd.f32 %v1455_v46, %v1447_v45 }
 0xa8a   :  { %v1427_v51 = vpop.permute.xlu1 %1426 }
 0xa8b   :  { %3457 = vtanh.f32 %v1457_v47  ;;  %v4029_v52 = vadd.f32 %v1427_v51, %v1419_v48 }
 0xa8d   :  { %3459 = vtanh.f32 %v4029_v52 }
 0xa95   :  { %v3458_v53 = vpop.eup %3457 }
 0xa96   :  { %1460 = vrot.lane.b32.xlu0 %v3458_v53, %s3671_s5  ;;  %v1791_v53 = vsel %vm1790_vm11, 1, %v3675_v1  ;;  %vm2889_vm11 = vcmask 254976  }
 0xa97   :  { %v3460_v55 = vpop.eup %3459 }
 0xa98   :  { %1432 = vrot.lane.b32.xlu1 %v3460_v55, %s3671_s5 }
 0xa9a   :  { %1527 = vperm.xlu0 %3368, %v1525_v54  }
 0xb08   :  { %v1461_v56 = vpop.permute.xlu0 %1460 }
 0xb09   :  { %v4036_v58 = vmul.f32 %v3454_v35, %v1461_v56 }
 0xb0a   :  { %v1433_v57 = vpop.permute.xlu1 %1432 }
 0xb0b   :  { %1531 = vrot.lane.b32.xlu1 %v4036_v58, %s3682_s14  ;;  %v4040_v59 = vmul.f32 %v3456_v40, %v1433_v57 }
 0xb0d   :  { %1543 = vrot.lane.b32.xlu0 %v4040_v59, %s3682_s14 }
 0xb0f   :  { %1536 = vrot.lane.b32.xlu1 %v1457_v47, %s3681_s18 }
 0xb19   :  { %v1528_v60 = vpop.permute.xlu0 %1527 }
 0xb1a   :  { %vm1529_vm10 = vcmp.eq.s32.totalorder %v1528_v60, 1 }
 0xb7d   :  { %v1532_v61 = vpop.permute.xlu1 %1531 }
 0xb7e   :  { %v1534_v62 = vsel %vm1529_vm10, %v3862_v50, %v1532_v61 }
 0xb7f   :  { %3170 = vmatmul.mubr.msk.f32.vlgmr.msra.gmra.mrb[12].mxu0 %vm410_vm2, %v1534_v62  ;;  %v1544_v34 = vpop.permute.xlu0 %1543 }
 0xb80   :  { %3322 = vmatpush3.bf16.msra.mxu0 %v3846_v44  ;;  %3191 = vmatprep.mubr.msk.f32.mxu0 %vm3678_vm0, %v3679_v5 }
 0xb81   :  { %3159 = vmatmul.mubr.msk.f32.vlgmr.msra.gmra.mrb[8].mxu1 %vm410_vm2, %v1544_v34  ;;  %3323 = vmatprep.subr.bf16.mxu0 %v3677_v4  ;;  %v1537_v19 = vpop.permute.xlu1 %1536  ;;  %v1885_v34 = vld [vmem:[#allocation3 + $0x4] sm:$0x3] }
 0xb82   :  { %3316 = vmatpush3.bf16.msra.mxu1 %v3826_v29  ;;  %3180 = vmatprep.mubr.msk.f32.mxu1 %vm3678_vm0, %v3679_v5  ;;  %v1539_v23 = vsel %vm1529_vm10, %v3837_v38, %v1537_v19  ;;  %vm645_vm10 = vcmask 253952  }
 0xb83   :  { %3317 = vmatprep.subr.bf16.mxu1 %v3677_v4 }
 0xb84   :  { %3325 = vmatpush3.bf16.msra.mxu0 %v3852_v49 }
 0xb85   :  { %3332 = vmatprep.subr.bf16.mxu0 %v3677_v4 }
 0xb86   :  { %3319 = vmatpush3.bf16.msra.mxu1 %v3834_v37 }
 0xb87   :  { %3326 = vmatprep.subr.bf16.mxu1 %v3677_v4 }
 0xc52   :  { %v1689_v3 = vpop.f32.mrb[12].mxu0 }
 0xc53   :  { %v1693_v7 = vadd.f32 %v1689_v3, %v1619_v2  ;;  %v3171_v10 = vpop.f32.mrb[13].mxu0  ;;  %v1807_v3 = vld [vmem:[#allocation2 + $0xa] sm:$0x3] }
 0xc54   :  { %v1613_v13 = vpop.f32.mrb[8].mxu1 }
 0xc55   :  { %v1617_v16 = vadd.f32 %v1613_v13, %v1541_v12  ;;  %3461 = vtanh.f32 %v1693_v7  ;;  %v3160_v17 = vpop.f32.mrb[9].mxu1  ;;  %v2956_v24 = vmul.f32 -1.442695, %v1693_v7 }
 0xc57   :  { %3463 = vtanh.f32 %v1617_v16  ;;  %v2955_v25 = vmul.f32 -1.442695, %v1617_v16 }
 0xc58   :  { %3465 = vpow2.f32 %v2956_v24 }
 0xc59   :  { %3467 = vpow2.f32 %v2955_v25 }
 0xc5f   :  { %v3462_v18 = vpop.eup %3461 }
 0xc60   :  { %1731 = vrot.lane.b32.xlu0 %v3462_v18, %s3671_s5 }
 0xc61   :  { %v3464_v21 = vpop.eup %3463 }
 0xc62   :  { %1703 = vrot.lane.b32.xlu1 %v3464_v21, %s3671_s5  ;;  %v3466_v26 = vpop.eup %3465 }
 0xc63   :  { %v3468_v27 = vpop.eup %3467  ;;  %v1721_v28 = vadd.f32 1.0, %v3466_v26 }
 0xc64   :  { %1726 = vrot.lane.b32.xlu0 %v1539_v23, %s3671_s5  ;;  %v1697_v30 = vadd.f32 1.0, %v3468_v27 }
 0xc65   :  { %3469 = vrcp.f32 %v1721_v28 }
 0xc66   :  { %3471 = vrcp.f32 %v1697_v30 }
 0xc6f   :  { %v3470_v31 = vpop.eup %3469 }
 0xc70   :  { %v3472_v35 = vpop.eup %3471 }
 0xc71   :  { %v1701_v45 = vmul.f32 %v3472_v35, %v4029_v52 }
 0xcd2   :  { %v1732_v32 = vpop.permute.xlu0 %1731 }
 0xcd3   :  { %v1734_v33 = vmul.f32 %v3470_v31, %v1732_v32 }
 0xcd4   :  { %v1704_v36 = vpop.permute.xlu1 %1703 }
 0xcd5   :  { %v1706_v39 = vmul.f32 %v3472_v35, %v1704_v36  ;;  %1736 = vrot.lane.b32.xlu1 %v1734_v33, %s3671_s5 }
 0xcd6   :  { %v1727_v40 = vpop.permute.xlu0 %1726 }
 0xcd7   :  { %1708 = vrot.lane.b32.xlu0 %v1706_v39, %s3671_s5  ;;  %v1729_v41 = vmul.f32 %v3470_v31, %v1727_v40 }
 0xd47   :  { %v1737_v42 = vpop.permute.xlu1 %1736 }
 0xd48   :  { %v1739_v43 = vadd.f32 %v1737_v42, %v1729_v41 }
 0xd49   :  { %v1709_v46 = vpop.permute.xlu0 %1708 }
 0xd4a   :  { %3473 = vtanh.f32 %v1739_v43  ;;  %v4069_v47 = vadd.f32 %v1709_v46, %v1701_v45 }
 0xd4c   :  { %3475 = vtanh.f32 %v4069_v47 }
 0xd54   :  { %v3474_v48 = vpop.eup %3473 }
 0xd55   :  { %1742 = vrot.lane.b32.xlu1 %v3474_v48, %s3671_s5 }
 0xd56   :  { %v3476_v51 = vpop.eup %3475 }
 0xd57   :  { %1714 = vrot.lane.b32.xlu0 %v3476_v51, %s3671_s5 }
 0xd59   :  { %1793 = vperm.xlu1 %3369, %v1791_v53   ;;  %v2057_v53 = vsel %vm2056_vm13, 1, %v3675_v1 }
 0xdc7   :  { %v1743_v54 = vpop.permute.xlu1 %1742 }
 0xdc8   :  { %v4076_v55 = vmul.f32 %v3470_v31, %v1743_v54 }
 0xdc9   :  { %v1715_v52 = vpop.permute.xlu0 %1714 }
 0xdca   :  { %v4078_v56 = vmul.f32 %v3472_v35, %v1715_v52  ;;  %1797 = vrot.lane.b32.xlu0 %v4076_v55, %s3682_s14 }
 0xdcc   :  { %1809 = vrot.lane.b32.xlu1 %v4078_v56, %s3682_s14 }
 0xdce   :  { %1802 = vrot.lane.b32.xlu0 %v1739_v43, %s3681_s18 }
 0xdd8   :  { %v1794_v57 = vpop.permute.xlu1 %1793 }
 0xdd9   :  { %vm1795_vm12 = vcmp.eq.s32.totalorder %v1794_v57, 1 }
 0xe3c   :  { %v1798_v60 = vpop.permute.xlu0 %1797 }
 0xe3d   :  { %v1800_v61 = vsel %vm1795_vm12, %v3862_v50, %v1798_v60 }
 0xe3e   :  { %v1810_v62 = vpop.permute.xlu1 %1809  ;;  %3192 = vmatmul.mubr.msk.f32.vlgmr.msra.gmra.mrb[14].mxu0 %vm410_vm2, %v1800_v61 }
 0xe3f   :  { %3181 = vmatmul.mubr.msk.f32.vlgmr.msra.gmra.mrb[10].mxu1 %vm410_vm2, %v1810_v62  ;;  %3334 = vmatpush3.bf16.msra.mxu0 %v3846_v44 }
 0xe40   :  { %3328 = vmatpush3.bf16.msra.mxu1 %v3826_v29  ;;  %3335 = vmatprep.subr.bf16.mxu0 %v3677_v4  ;;  %v1803_v19 = vpop.permute.xlu0 %1802 }
 0xe41   :  { %3329 = vmatprep.subr.bf16.mxu1 %v3677_v4  ;;  %3202 = vmatprep.mubr.msk.f32.mxu1 %vm3678_vm0, %v3679_v5  ;;  %v1805_v21 = vsel %vm1795_vm12, %v3837_v38, %v1803_v19 }
 0xe42   :  { %3213 = vmatprep.mubr.msk.f32.mxu0 %vm3678_vm0, %v3679_v5 }
 0xe43   :  { %3337 = vmatpush3.bf16.msra.mxu0 %v3852_v49 }
 0xe44   :  { %3331 = vmatpush3.bf16.msra.mxu1 %v3834_v37  ;;  %3344 = vmatprep.subr.bf16.mxu0 %v3677_v4 }
 0xe45   :  { %3338 = vmatprep.subr.bf16.mxu1 %v3677_v4 }
 0xf11   :  { %v1955_v2 = vpop.f32.mrb[14].mxu0 }
 0xf12   :  { %v1879_v7 = vpop.f32.mrb[10].mxu1  ;;  %v1959_v10 = vadd.f32 %v1955_v2, %v1885_v34  ;;  %v3193_v12 = vpop.f32.mrb[15].mxu0  ;;  %v2151_v2 = vld [vmem:[#allocation3 + $0x2] sm:$0x3] }
 0xf13   :  { %v1883_v13 = vadd.f32 %v1879_v7, %v1807_v3  ;;  %v3182_v16 = vpop.f32.mrb[11].mxu1 }
 0xf14   :  { %3477 = vtanh.f32 %v1959_v10  ;;  %v2960_v23 = vmul.f32 -1.442695, %v1959_v10 }
 0xf15   :  { %3479 = vtanh.f32 %v1883_v13  ;;  %v2959_v24 = vmul.f32 -1.442695, %v1883_v13 }
 0xf16   :  { %3481 = vpow2.f32 %v2960_v23 }
 0xf17   :  { %3483 = vpow2.f32 %v2959_v24 }
 0xf1e   :  { %v3478_v17 = vpop.eup %3477 }
 0xf1f   :  { %v3480_v18 = vpop.eup %3479  ;;  %1997 = vrot.lane.b32.xlu1 %v3478_v17, %s3671_s5 }
 0xf20   :  { %1969 = vrot.lane.b32.xlu0 %v3480_v18, %s3671_s5  ;;  %v3482_v25 = vpop.eup %3481 }
 0xf21   :  { %v3484_v26 = vpop.eup %3483  ;;  %v1987_v27 = vadd.f32 1.0, %v3482_v25 }
 0xf22   :  { %v1963_v28 = vadd.f32 1.0, %v3484_v26 }
 0xf23   :  { %1992 = vrot.lane.b32.xlu1 %v1805_v21, %s3671_s5  ;;  %3485 = vrcp.f32 %v1987_v27 }
 0xf24   :  { %3487 = vrcp.f32 %v1963_v28 }
 0xf2d   :  { %v3486_v30 = vpop.eup %3485 }
 0xf2e   :  { %v3488_v32 = vpop.eup %3487 }
 0xf2f   :  { %v1967_v41 = vmul.f32 %v3488_v32, %v4069_v47 }
 0xf91   :  { %v1998_v31 = vpop.permute.xlu1 %1997 }
 0xf92   :  { %v1970_v33 = vpop.permute.xlu0 %1969  ;;  %v2000_v35 = vmul.f32 %v3486_v30, %v1998_v31 }
 0xf93   :  { %v1972_v36 = vmul.f32 %v3488_v32, %v1970_v33 }
 0xf94   :  { %2002 = vrot.lane.b32.xlu0 %v2000_v35, %s3671_s5 }
 0xf95   :  { %1974 = vrot.lane.b32.xlu1 %v1972_v36, %s3671_s5  ;;  %v1993_v39 = vpop.permute.xlu1 %1992 }
 0xf96   :  { %v1995_v40 = vmul.f32 %v3486_v30, %v1993_v39 }
0x1006   :  { %v2003_v42 = vpop.permute.xlu0 %2002 }
0x1007   :  { %v1975_v43 = vpop.permute.xlu1 %1974  ;;  %v2005_v45 = vadd.f32 %v2003_v42, %v1995_v40 }
0x1008   :  { %v4109_v46 = vadd.f32 %v1975_v43, %v1967_v41 }
0x1009   :  { %3489 = vtanh.f32 %v2005_v45 }
0x100a   :  { %3491 = vtanh.f32 %v4109_v46 }
0x1013   :  { %v3490_v48 = vpop.eup %3489 }
0x1014   :  { %v3492_v51 = vpop.eup %3491  ;;  %2008 = vrot.lane.b32.xlu0 %v3490_v48, %s3671_s5 }
0x1015   :  { %1980 = vrot.lane.b32.xlu1 %v3492_v51, %s3671_s5 }
0x1018   :  { %2059 = vperm.xlu0 %3368, %v2057_v53  }
0x1086   :  { %v2009_v47 = vpop.permute.xlu0 %2008 }
0x1087   :  { %v1981_v54 = vpop.permute.xlu1 %1980  ;;  %v4116_v52 = vmul.f32 %v3486_v30, %v2009_v47 }
0x1088   :  { %v4118_v57 = vmul.f32 %v3488_v32, %v1981_v54 }
0x1089   :  { %2063 = vrot.lane.b32.xlu1 %v4116_v52, %s3682_s14 }
0x108a   :  { %2075 = vrot.lane.b32.xlu0 %v4118_v57, %s3682_s14 }
0x108d   :  { %2068 = vrot.lane.b32.xlu1 %v2005_v45, %s3681_s18  ;;  %v2323_v45 = vsel %vm2322_vm15, 1, %v3675_v1 }
0x1097   :  { %v2060_v60 = vpop.permute.xlu0 %2059 }
0x1098   :  { %vm2061_vm14 = vcmp.eq.s32.totalorder %v2060_v60, 1  ;;  %v2339_v60 = vld [vmem:[#allocation2 + $0xe] sm:$0x3] }
0x10fb   :  { %v2064_v61 = vpop.permute.xlu1 %2063 }
0x10fc   :  { %v2076_v62 = vpop.permute.xlu0 %2075  ;;  %v2066_v34 = vsel %vm2061_vm14, %v3862_v50, %v2064_v61 }
0x10fd   :  { %3203 = vmatmul.mubr.msk.f32.vlgmr.msra.gmra.mrb[12].mxu1 %vm410_vm2, %v2076_v62  ;;  %3214 = vmatmul.mubr.msk.f32.vlgmr.msra.gmra.mrb[16].mxu0 %vm410_vm2, %v2066_v34 }
0x10fe   :  { %3340 = vmatpush3.bf16.msra.mxu1 %v3826_v29  ;;  %3346 = vmatpush3.bf16.msra.mxu0 %v3846_v44  ;;  %v2073_v29 = vld [vmem:[#allocation2 + $0xc] sm:$0x3] }
0x10ff   :  { %3341 = vmatprep.subr.bf16.mxu1 %v3677_v4  ;;  %3224 = vmatprep.mubr.msk.f32.mxu1 %vm3678_vm0, %v3679_v5 }
0x1100   :  { %3347 = vmatprep.subr.bf16.mxu0 %v3677_v4  ;;  %3235 = vmatprep.mubr.msk.f32.mxu0 %vm3678_vm0, %v3679_v5 }
0x1102   :  { %3343 = vmatpush3.bf16.msra.mxu1 %v3834_v37  ;;  %3349 = vmatpush3.bf16.msra.mxu0 %v3852_v49  ;;  %v2069_v37 = vpop.permute.xlu1 %2068 }
0x1103   :  { %3246 = vmatprep.subr.bf16.mxu0 %v3679_v5  ;;  %3238 = vmatprep.subr.bf16.mxu1 %v3679_v5  ;;  %v2071_v49 = vsel %vm2061_vm14, %v3837_v38, %v2069_v37 }
0x11d0   :  { %v2145_v44 = vpop.f32.mrb[12].mxu1  ;;  %v2221_v3 = vpop.f32.mrb[16].mxu0 }
0x11d1   :  { %v2149_v7 = vadd.f32 %v2145_v44, %v2073_v29  ;;  %v3204_v10 = vpop.f32.mrb[13].mxu1  ;;  %v2225_v12 = vadd.f32 %v2221_v3, %v2151_v2  ;;  %v3215_v13 = vpop.f32.mrb[17].mxu0  ;;  %v2416_v29 = vld [vmem:[#allocation3] sm:$0x3] }
0x11d3   :  { %3493 = vtanh.f32 %v2149_v7  ;;  %v2963_v17 = vmul.f32 -1.442695, %v2149_v7  ;;  %v2964_v18 = vmul.f32 -1.442695, %v2225_v12 }
0x11d4   :  { %3495 = vtanh.f32 %v2225_v12 }
0x11d5   :  { %3497 = vpow2.f32 %v2963_v17 }
0x11d6   :  { %3499 = vpow2.f32 %v2964_v18 }
0x11dd   :  { %v3494_v4 = vpop.eup %3493 }
0x11de   :  { %v3496_v16 = vpop.eup %3495  ;;  %2235 = vrot.lane.b32.xlu1 %v3494_v4, %s3671_s5 }
0x11df   :  { %2263 = vrot.lane.b32.xlu0 %v3496_v16, %s3671_s5  ;;  %v3498_v19 = vpop.eup %3497 }
0x11e0   :  { %v3500_v21 = vpop.eup %3499  ;;  %v2229_v23 = vadd.f32 1.0, %v3498_v19 }
0x11e1   :  { %v2253_v24 = vadd.f32 1.0, %v3500_v21  ;;  %v2933_v21 = vsel %vm647_vm3, 1.0, %v3679_v5 }
0x11e2   :  { %3501 = vrcp.f32 %v2229_v23  ;;  %v3525_v23 = vld [vmem:[%s4356_s1] sm:$0x3] }
0x11e3   :  { %2258 = vrot.lane.b32.xlu0 %v2071_v49, %s3671_s5  ;;  %3503 = vrcp.f32 %v2253_v24  ;;  %vm930_vm5 = vcmp.gt.s32.totalorder %v3525_v23, 6  ;;  %vm1182_vm6 = vcmp.gt.s32.totalorder %v3525_v23, 2  ;;  %vm1212_vm7 = vcmp.gt.s32.totalorder %v3525_v23, 5 }
0x11e4   :  { %vm1464_vm8 = vcmp.gt.s32.totalorder %v3525_v23, 3  ;;  %vm1494_vm9 = vcmp.gt.s32.totalorder %v3525_v23, 4 }
0x11ec   :  { %v3502_v25 = vpop.eup %3501 }
0x11ed   :  { %v3504_v27 = vpop.eup %3503  ;;  %v2233_v33 = vmul.f32 %v3502_v25, %v4109_v46 }
0x1250   :  { %v2236_v26 = vpop.permute.xlu1 %2235 }
0x1251   :  { %v2238_v28 = vmul.f32 %v3502_v25, %v2236_v26  ;;  %v2264_v30 = vpop.permute.xlu0 %2263 }
0x1252   :  { %v2266_v31 = vmul.f32 %v3504_v27, %v2264_v30  ;;  %v2940_v30 = vsel %vm930_vm5, 1.0, %v3679_v5 }
0x1253   :  { %2240 = vrot.lane.b32.xlu0 %v2238_v28, %s3671_s5  ;;  %v2939_v28 = vsel %vm900_vm4, 1.0, %v3679_v5 }
0x1254   :  { %2268 = vrot.lane.b32.xlu1 %v2266_v31, %s3671_s5 }
0x1255   :  { %v2259_v32 = vpop.permute.xlu0 %2258 }
0x1256   :  { %v2261_v35 = vmul.f32 %v3504_v27, %v2259_v32  ;;  %v2946_v32 = vsel %vm1212_vm7, 1.0, %v3679_v5 }
0x12c5   :  { %v2241_v36 = vpop.permute.xlu0 %2240 }
0x12c6   :  { %v4149_v39 = vadd.f32 %v2241_v36, %v2233_v33  ;;  %v2269_v40 = vpop.permute.xlu1 %2268  ;;  %v3375_v33 = vpack.i.bf16 %v2940_v30, %v2939_v28  ;;  %v2951_v36 = vsel %vm1464_vm8, 1.0, %v3679_v5 }
0x12c7   :  { %v2271_v41 = vadd.f32 %v2269_v40, %v2261_v35  ;;  %v2952_v40 = vsel %vm1494_vm9, 1.0, %v3679_v5 }
0x12c8   :  { %3505 = vtanh.f32 %v4149_v39 }
0x12c9   :  { %3507 = vtanh.f32 %v2271_v41 }
0x12d2   :  { %v3506_v42 = vpop.eup %3505 }
0x12d3   :  { %v3508_v43 = vpop.eup %3507  ;;  %2246 = vrot.lane.b32.xlu0 %v3506_v42, %s3671_s5 }
0x12d4   :  { %2274 = vrot.lane.b32.xlu1 %v3508_v43, %s3671_s5 }
0x12d8   :  { %2325 = vperm.xlu1 %3369, %v2323_v45  }
0x1345   :  { %v2247_v46 = vpop.permute.xlu0 %2246 }
0x1346   :  { %v4156_v48 = vmul.f32 %v3502_v25, %v2247_v46  ;;  %v2275_v51 = vpop.permute.xlu1 %2274 }
0x1347   :  { %v4158_v53 = vmul.f32 %v3504_v27, %v2275_v51 }
0x1348   :  { %2341 = vrot.lane.b32.xlu1 %v4156_v48, %s3682_s14 }
0x1349   :  { %2329 = vrot.lane.b32.xlu0 %v4158_v53, %s3682_s14 }
0x134d   :  { %2334 = vrot.lane.b32.xlu0 %v2271_v41, %s3681_s18  ;;  %v3385_v41 = vpack.i.bf16 %v2952_v40, %v2951_v36 }
0x1357   :  { %v2326_v15 = vpop.permute.xlu1 %2325 }
0x1358   :  { %vm2327_vm1 = vcmp.eq.s32.totalorder %v2326_v15, 1 }
0x13ba   :  { %v2342_v47 = vpop.permute.xlu1 %2341 }
0x13bb   :  { %3225 = vmatmul.mubr.msk.f32.vlgmr.msra.gmra.mrb[14].mxu1 %vm410_vm2, %v2342_v47  ;;  %v2330_v1 = vpop.permute.xlu0 %2329 }
0x13bc   :  { %v2332_v54 = vsel %vm2327_vm1, %v3862_v50, %v2330_v1  ;;  %3242 = vmatprep.mubr.msk.bf16.mxu1 %vm3678_vm0, %v3679_v5 }
0x13bd   :  { %3236 = vmatmul.mubr.msk.f32.vlgmr.msra.gmra.mrb[18].mxu0 %vm410_vm2, %v2332_v54 }
0x13be   :  { %3250 = vmatprep.mubr.msk.bf16.mxu0 %vm3678_vm0, %v3679_v5  ;;  %vm617_vm0 = vcmp.gt.s32.totalorder %v3906_v14, 0  ;;  %v2945_v14 = vsel %vm1182_vm6, 1.0, %v3679_v5 }
0x13bf   :  { %v2335_v50 = vpop.permute.xlu0 %2334  ;;  %v2932_v18 = vsel %vm617_vm0, 1.0, %v3679_v5  ;;  %v3380_v35 = vpack.i.bf16 %v2946_v32, %v2945_v14 }
0x13c0   :  { %v2337_v12 = vsel %vm2327_vm1, %v3837_v38, %v2335_v50  ;;  %v3370_v27 = vpack.i.bf16 %v2933_v21, %v2932_v18 }
0x148e   :  { %v2411_v61 = vpop.f32.mrb[14].mxu1 }
0x148f   :  { %v2415_v62 = vadd.f32 %v2411_v61, %v2339_v60  ;;  %v3226_v34 = vpop.f32.mrb[15].mxu1 }
0x1490   :  { %v2486_v44 = vpop.f32.mrb[18].mxu0 }
0x1491   :  { %3509 = vtanh.f32 %v2415_v62  ;;  %v2490_v2 = vadd.f32 %v2486_v44, %v2416_v29  ;;  %v3237_v3 = vpop.f32.mrb[19].mxu0  ;;  %v2967_v13 = vmul.f32 -1.442695, %v2415_v62 }
0x1493   :  { %3511 = vtanh.f32 %v2490_v2  ;;  %v2968_v4 = vmul.f32 -1.442695, %v2490_v2 }
0x1494   :  { %3513 = vpow2.f32 %v2967_v13 }
0x1495   :  { %3515 = vpow2.f32 %v2968_v4 }
0x149b   :  { %v3510_v7 = vpop.eup %3509 }
0x149c   :  { %2500 = vrot.lane.b32.xlu1 %v3510_v7, %s3671_s5 }
0x149d   :  { %v3512_v10 = vpop.eup %3511 }
0x149e   :  { %2528 = vrot.lane.b32.xlu0 %v3512_v10, %s3671_s5  ;;  %v3514_v16 = vpop.eup %3513 }
0x149f   :  { %v3516_v37 = vpop.eup %3515  ;;  %v2494_v49 = vadd.f32 1.0, %v3514_v16 }
0x14a0   :  { %2523 = vrot.lane.b32.xlu1 %v2337_v12, %s3671_s5  ;;  %v2518_v17 = vadd.f32 1.0, %v3516_v37 }
0x14a1   :  { %3517 = vrcp.f32 %v2494_v49 }
0x14a2   :  { %3519 = vrcp.f32 %v2518_v17 }
0x14ab   :  { %v4181_v19 = vpop.eup %3517 }
0x14ac   :  { %v4189_v25 = vpop.eup %3519  ;;  %v2498_v43 = vmul.f32 %v4181_v19, %v4149_v39 }
0x150e   :  { %v2501_v38 = vpop.permute.xlu1 %2500 }
0x150f   :  { %v2503_v24 = vmul.f32 %v4181_v19, %v2501_v38 }
0x1510   :  { %v2529_v26 = vpop.permute.xlu0 %2528 }
0x1511   :  { %2505 = vrot.lane.b32.xlu0 %v2503_v24, %s3671_s5  ;;  %v2531_v31 = vmul.f32 %v4189_v25, %v2529_v26 }
0x1512   :  { %v2524_v42 = vpop.permute.xlu1 %2523 }
0x1513   :  { %2533 = vrot.lane.b32.xlu1 %v2531_v31, %s3671_s5  ;;  %v2526_v51 = vmul.f32 %v4189_v25, %v2524_v42 }
0x1515   :  { %3371 = vperm.xlu0 %3368, %v3370_v27  }
0x1517   :  { %3376 = vperm.xlu1 %3369, %v3375_v33  }
0x1519   :  { %3381 = vperm.xlu0 %3368, %v3380_v35  }
0x151b   :  { %3386 = vperm.xlu1 %3369, %v3385_v41  }
0x1583   :  { %v2506_v45 = vpop.permute.xlu0 %2505 }
0x1584   :  { %v2508_v46 = vadd.f32 %v2506_v45, %v2498_v43 }
0x1585   :  { %v2534_v15 = vpop.permute.xlu1 %2533 }
0x1586   :  { %3521 = vtanh.f32 %v2508_v46  ;;  %v2536_v47 = vadd.f32 %v2534_v15, %v2526_v51 }
0x1588   :  { %3523 = vtanh.f32 %v2536_v47 }
0x1590   :  { %v3522_v1 = vpop.eup %3521 }
0x1591   :  { %2511 = vrot.lane.b32.xlu0 %v3522_v1, %s3671_s5 }
0x1592   :  { %v3524_v54 = vpop.eup %3523 }
0x1593   :  { %2539 = vrot.lane.b32.xlu1 %v3524_v54, %s3671_s5 }
0x1594   :  { %v4205_v60 = vpop.permute.xlu0 %3371 }
0x1595   :  { %v3374_v61 = vunpack.i.h.bf16 %v4205_v60  ;;  %v3373_v39 = vunpack.i.l.bf16 %v4205_v60 }
0x1596   :  { %v3377_v29 = vpop.permute.xlu1 %3376 }
0x1597   :  { %v655_v62 = vmul.f32 %v3374_v61, %v3917_v20  ;;  %v625_v34 = vmul.f32 %v3373_v39, %v3921_v22  ;;  %v3379_v44 = vunpack.i.h.bf16 %v3377_v29  ;;  %v3378_v2 = vunpack.i.l.bf16 %v3377_v29 }
0x1598   :  { %v3382_v3 = vpop.permute.xlu0 %3381 }
0x1599   :  { %v3384_v7 = vunpack.i.h.bf16 %v3382_v3  ;;  %v3383_v50 = vunpack.i.l.bf16 %v3382_v3  ;;  %v938_v10 = vmul.f32 %v3379_v44, %v3956_v8  ;;  %v908_v12 = vmul.f32 %v3378_v2, %v3960_v11 }
0x159a   :  { %v656_v13 = vpack.c.bf16 %v655_v62, %v655_v62  ;;  %v626_v4 = vpack.c.bf16 %v625_v34, %v625_v34  ;;  %v3387_v16 = vpop.permute.xlu1 %3386  ;;  %v2278_v45 = vmul.f32 %v3379_v44, %v4156_v48 }
0x159b   :  { %v1220_v37 = vmul.f32 %v3384_v7, %v3996_v6  ;;  %v1190_v20 = vmul.f32 %v3383_v50, %v4000_v0  ;;  %v939_v49 = vpack.c.bf16 %v938_v10, %v938_v10  ;;  %v909_v17 = vpack.c.bf16 %v908_v12, %v908_v12 }
0x159c   :  { %v3389_v22 = vunpack.i.h.bf16 %v3387_v16  ;;  %v3388_v18 = vunpack.i.l.bf16 %v3387_v16  ;;  %v664_v38 = vrot.slane %v656_v13, %v3820_v9  ;;  %v634_v21 = vrot.slane %v626_v4, %v3820_v9  ;;  %v3393_v4 = vld [vmem:[%s4362_s7] sm:$0xff]  }
0x159d   :  { %v1221_v23 = vpack.c.bf16 %v1220_v37, %v1220_v37  ;;  %v1191_v24 = vpack.c.bf16 %v1190_v20, %v1190_v20  ;;  %v947_v0 = vrot.slane %v939_v49, %v3820_v9  ;;  %v917_v27 = vrot.slane %v909_v17, %v3820_v9  ;;  %v3394_v16 = vld [vmem:[%s4363_s8] sm:$0xff]   ;;  %3247 = vmatpush3.bf16.msra.mxu0 %v3393_v4  ;;  %v3395_v49 = vld [vmem:[%s4362_s7 + $0x8] sm:$0xff]  }
0x159e   :  { %v1502_v8 = vmul.f32 %v3389_v22, %v4036_v58  ;;  %v1472_v11 = vmul.f32 %v3388_v18, %v4040_v59  ;;  %v671_v26 = vrot.slane %v664_v38, %v3820_v9  ;;  %v641_v6 = vrot.slane %v634_v21, %v3820_v9  ;;  %3239 = vmatpush3.bf16.msra.mxu1 %v3394_v16 }
0x159f   :  { %v954_v28 = vrot.slane %v947_v0, %v3820_v9  ;;  %v924_v30 = vrot.slane %v917_v27, %v3820_v9  ;;  %v1746_v58 = vmul.f32 %v3389_v22, %v4078_v56  ;;  %v1768_v59 = vmul.f32 %v3388_v18, %v4076_v55  ;;  %3248 = vmatprep.subr.bf16.mxu0 %v3679_v5 }
0x15a0   :  { %672 = vrot.lane.b32.xlu1 %v671_v26, %s3682_s14  ;;  %642 = vrot.lane.b32.xlu0 %v641_v6, %s3682_s14  ;;  %v1503_v14 = vpack.c.bf16 %v1502_v8, %v1502_v8  ;;  %v1473_v31 = vpack.c.bf16 %v1472_v11, %v1472_v11  ;;  %v1229_v32 = vrot.slane %v1221_v23, %v3820_v9 }
0x15a1   :  { %v1199_v33 = vrot.slane %v1191_v24, %v3820_v9  ;;  %v2012_v35 = vmul.f32 %v3384_v7, %v4118_v57  ;;  %v2034_v36 = vmul.f32 %v3383_v50, %v4116_v52  ;;  %v1747_v40 = vpack.c.bf16 %v1746_v58, %v1746_v58  ;;  %3240 = vmatprep.subr.bf16.mxu1 %v3679_v5 }
0x15a2   :  { %v1769_v41 = vpack.c.bf16 %v1768_v59, %v1768_v59  ;;  %v1236_v56 = vrot.slane %v1229_v32, %v3820_v9  ;;  %v1511_v42 = vrot.slane %v1503_v14, %v3820_v9  ;;  %v1481_v43 = vrot.slane %v1473_v31, %v3820_v9  ;;  %3249 = vmatpush3.bf16.msra.mxu0 %v3395_v49 }
0x15a3   :  { %v1206_v55 = vrot.slane %v1199_v33, %v3820_v9  ;;  %v2300_v57 = vmul.f32 %v3378_v2, %v4158_v53  ;;  %v2013_v46 = vpack.c.bf16 %v2012_v35, %v2012_v35  ;;  %v2035_v52 = vpack.c.bf16 %v2034_v36, %v2034_v36 }
0x15a4   :  { %955 = vrot.lane.b32.xlu1 %v954_v28, %s3682_s14  ;;  %925 = vrot.lane.b32.xlu0 %v924_v30, %s3682_s14  ;;  %v1777_v51 = vrot.slane %v1769_v41, %v3820_v9  ;;  %v1518_v15 = vrot.slane %v1511_v42, %v3820_v9  ;;  %v1488_v47 = vrot.slane %v1481_v43, %v3820_v9 }
0x15a5   :  { %v1755_v1 = vrot.slane %v1747_v40, %v3820_v9  ;;  %v2279_v54 = vpack.c.bf16 %v2278_v45, %v2278_v45  ;;  %v2301_v62 = vpack.c.bf16 %v2300_v57, %v2300_v57  ;;  %v2021_v48 = vrot.slane %v2013_v46, %v3820_v9 }
0x15a6   :  { %v2043_v53 = vrot.slane %v2035_v52, %v3820_v9  ;;  %v1784_v34 = vrot.slane %v1777_v51, %v3820_v9 }
0x15a7   :  { %v1762_v29 = vrot.slane %v1755_v1, %v3820_v9  ;;  %v2287_v44 = vrot.slane %v2279_v54, %v3820_v9  ;;  %v2309_v2 = vrot.slane %v2301_v62, %v3820_v9  ;;  %v2028_v7 = vrot.slane %v2021_v48, %v3820_v9 }
0x15a8   :  { %1237 = vrot.lane.b32.xlu1 %v1236_v56, %s3682_s14  ;;  %1207 = vrot.lane.b32.xlu0 %v1206_v55, %s3682_s14  ;;  %v2050_v3 = vrot.slane %v2043_v53, %v3820_v9 }
0x15a9   :  { %v2316_v50 = vrot.slane %v2309_v2, %v3820_v9  ;;  %v2294_v10 = vrot.slane %v2287_v44, %v3820_v9 }
0x15ac   :  { %1519 = vrot.lane.b32.xlu1 %v1518_v15, %s3682_s14  ;;  %1489 = vrot.lane.b32.xlu0 %v1488_v47, %s3682_s14 }
0x15b0   :  { %1785 = vrot.lane.b32.xlu1 %v1784_v34, %s3682_s14  ;;  %1763 = vrot.lane.b32.xlu0 %v1762_v29, %s3682_s14 }
0x15b4   :  { %2051 = vrot.lane.b32.xlu1 %v2050_v3, %s3682_s14  ;;  %2029 = vrot.lane.b32.xlu0 %v2028_v7, %s3682_s14 }
0x15b8   :  { %2317 = vrot.lane.b32.xlu1 %v2316_v50, %s3682_s14  ;;  %2295 = vrot.lane.b32.xlu0 %v2294_v10, %s3682_s14 }
0x1603   :  { %v2512_v12 = vpop.permute.xlu0 %2511 }
0x1604   :  { %v2514_v13 = vmul.f32 %v4181_v19, %v2512_v12  ;;  %v3396_v19 = vld [vmem:[%s4363_s8 + $0x8] sm:$0xff]  }
0x1605   :  { %v2540_v20 = vpop.permute.xlu1 %2539  ;;  %3241 = vmatpush3.bf16.msra.mxu1 %v3396_v19 }
0x1606   :  { %v2543_v37 = vmul.f32 %v3374_v61, %v2514_v13  ;;  %v2542_v17 = vmul.f32 %v4189_v25, %v2540_v20 }
0x1608   :  { %v2544_v22 = vpack.c.bf16 %v2543_v37, %v2543_v37  ;;  %v2565_v61 = vmul.f32 %v3373_v39, %v2542_v17 }
0x160a   :  { %v2552_v18 = vrot.slane %v2544_v22, %v3820_v9  ;;  %v2566_v38 = vpack.c.bf16 %v2565_v61, %v2565_v61 }
0x160c   :  { %v2559_v21 = vrot.slane %v2552_v18, %v3820_v9  ;;  %v2574_v23 = vrot.slane %v2566_v38, %v3820_v9 }
0x160e   :  { %2560 = vrot.lane.b32.xlu0 %v2559_v21, %s3682_s14  ;;  %v2581_v25 = vrot.slane %v2574_v23, %v3820_v9 }
0x1610   :  { %2582 = vrot.lane.b32.xlu1 %v2581_v25, %s3682_s14 }
0x1612   :  { %v673_v5 = vpop.permute.xlu1 %672  ;;  %v643_v24 = vpop.permute.xlu0 %642 }
0x1613   :  { %676 = vst.msk [vmem:[#allocation5 + $0x7] sm:$0x1] %vm645_vm10, %v673_v5  ;;  %646 = vst.msk [vmem:[#allocation4] sm:$0x1] %vm645_vm10, %v643_v24  ;;  %v2975_v5 = vld [vmem:[%s4364_s9] ss:$0 sm:$0xff] }
0x1614   :  { %s3683_s9 = smov [#allocation15]  }
0x1615   :  { %s2903_s29 = sshll.u32 %s3683_s9, 4  ;;  %s2904_s29 = int_to_ptr.vmem [resolvable:$true] %s2903_s29 }
0x1616   :  { %v956_v60 = vpop.permute.xlu1 %955  ;;  %v926_v39 = vpop.permute.xlu0 %925  ;;  %s3636_s11 = scalar_lea.vmem %s2904_s29, 256  ;;  %p3641_p13 = scmp.lt.s32.totalorder %s2904_s29, %s2904_s29 }
0x1617   :  { %959 = vst.msk [vmem:[#allocation5 + $0x6] sm:$0x1] %vm645_vm10, %v956_v60  ;;  %929 = vst.msk [vmem:[#allocation4 + $0x1] sm:$0x1] %vm645_vm10, %v926_v39  ;;  %p3637_p12 = scmp.ne.s32.totalorder %s2904_s29, %s3636_s11  ;;  %p3642_p0 = scmp.lt.s32.totalorder %s3636_s11, %s3636_s11 }
0x1619   :  { %p3643_p1 = por %p3642_p0, %p3641_p13 }
0x161a   :  { %v1238_v8 = vpop.permute.xlu1 %1237  ;;  %v1208_v11 = vpop.permute.xlu0 %1207  ;;  %v2586_v41 = vld [vmem:[#allocation4] sm:$0x1]  ;;  %v2601_v15 = vld [vmem:[#allocation5 + $0x7] sm:$0x1] }
0x161b   :  { %1241 = vst.msk [vmem:[#allocation5 + $0x5] sm:$0x1] %vm645_vm10, %v1238_v8  ;;  %1211 = vst.msk [vmem:[#allocation4 + $0x2] sm:$0x1] %vm645_vm10, %v1208_v11  ;;  %p3644_p2 = pnand %p3643_p1, %p3637_p12 }
0x161e   :  { %v1520_v26 = vpop.permute.xlu1 %1519  ;;  %v1490_v6 = vpop.permute.xlu0 %1489  ;;  %v2587_v32 = vld [vmem:[#allocation4 + $0x1] sm:$0x1]  ;;  %v2600_v43 = vld [vmem:[#allocation5 + $0x6] sm:$0x1] }
0x161f   :  { %1523 = vst.msk [vmem:[#allocation5 + $0x4] sm:$0x1] %vm645_vm10, %v1520_v26  ;;  %1493 = vst.msk [vmem:[#allocation4 + $0x3] sm:$0x1] %vm645_vm10, %v1490_v6  ;;  %v2731_v55 = vcombine.low %v2586_v41, %v2587_v32  ;;  %v2621_v54 = vcombine.low %v2600_v43, %v2601_v15 }
0x1621   :  { %v2741_v48 = vrot.slane %v2731_v55, %v3820_v9  ;;  %v2649_v12 = vrot.slane %v2621_v54, %v3820_v9 }
0x1622   :  { %v1786_v0 = vpop.permute.xlu1 %1785  ;;  %v1764_v27 = vpop.permute.xlu0 %1763  ;;  %v2588_v33 = vld [vmem:[#allocation4 + $0x2] sm:$0x1]  ;;  %v2599_v42 = vld [vmem:[#allocation5 + $0x5] sm:$0x1] }
0x1623   :  { %1789 = vst.msk [vmem:[#allocation5 + $0x3] sm:$0x1] %vm645_vm10, %v1786_v0  ;;  %1767 = vst.msk [vmem:[#allocation4 + $0x4] sm:$0x1] %vm645_vm10, %v1764_v27 }
0x1626   :  { %v2052_v28 = vpop.permute.xlu1 %2051  ;;  %v2030_v30 = vpop.permute.xlu0 %2029  ;;  %v2589_v31 = vld [vmem:[#allocation4 + $0x3] sm:$0x1]  ;;  %v2598_v40 = vld [vmem:[#allocation5 + $0x4] sm:$0x1] }
0x1627   :  { %2055 = vst.msk [vmem:[#allocation5 + $0x2] sm:$0x1] %vm645_vm10, %v2052_v28  ;;  %2033 = vst.msk [vmem:[#allocation4 + $0x5] sm:$0x1] %vm645_vm10, %v2030_v30  ;;  %v2732_v36 = vcombine.low %v2588_v33, %v2589_v31  ;;  %v2620_v57 = vcombine.low %v2598_v40, %v2599_v42 }
0x1629   :  { %v2748_v52 = vrot.slane %v2732_v36, %v3820_v9  ;;  %v2642_v29 = vrot.slane %v2620_v57, %v3820_v9 }
0x162a   :  { %v2318_v58 = vpop.permute.xlu1 %2317  ;;  %v2296_v59 = vpop.permute.xlu0 %2295  ;;  %v2590_v45 = vld [vmem:[#allocation4 + $0x4] sm:$0x1]  ;;  %v2597_v53 = vld [vmem:[#allocation5 + $0x3] sm:$0x1] }
0x162b   :  { %2321 = vst.msk [vmem:[#allocation5 + $0x1] sm:$0x1] %vm645_vm10, %v2318_v58  ;;  %2299 = vst.msk [vmem:[#allocation4 + $0x6] sm:$0x1] %vm645_vm10, %v2296_v59  ;;  %v2763_v3 = vcombine.low %v2741_v48, %v2748_v52  ;;  %v2651_v37 = vcombine.low %v2642_v29, %v2649_v12 }
0x162d   :  { %v2771_v20 = vrot.slane %v2763_v3, %v3820_v9  ;;  %v2665_v61 = vrot.slane %v2651_v37, %v3820_v9 }
0x162e   :  { %v2591_v56 = vld [vmem:[#allocation4 + $0x5] sm:$0x1]  ;;  %v2596_v51 = vld [vmem:[#allocation5 + $0x2] sm:$0x1] }
0x162f   :  { %v2733_v46 = vcombine.low %v2590_v45, %v2591_v56  ;;  %v2619_v34 = vcombine.low %v2596_v51, %v2597_v53 }
0x1631   :  { %v2755_v44 = vrot.slane %v2733_v46, %v3820_v9  ;;  %v2635_v16 = vrot.slane %v2619_v34, %v3820_v9 }
0x1632   :  { %v2592_v47 = vld [vmem:[#allocation4 + $0x6] sm:$0x1]  ;;  %v2595_v50 = vld [vmem:[#allocation5 + $0x1] sm:$0x1] }
0x1680   :  { %v2561_v14 = vpop.permute.xlu0 %2560 }
0x1681   :  { %2564 = vst.msk [vmem:[#allocation4 + $0x7] sm:$0x1] %vm645_vm10, %v2561_v14 }
0x1682   :  { %v2583_v35 = vpop.permute.xlu1 %2582 }
0x1683   :  { %2585 = vst.msk [vmem:[#allocation5] sm:$0x1] %vm645_vm10, %v2583_v35 }
0x1688   :  { %v2593_v1 = vld [vmem:[#allocation4 + $0x7] sm:$0x1] }
0x1689   :  { %v2734_v62 = vcombine.low %v2592_v47, %v2593_v1 }
0x168a   :  { %v2594_v7 = vld [vmem:[#allocation5] sm:$0x1] }
0x168b   :  { %v2762_v2 = vrot.slane %v2734_v62, %v3820_v9  ;;  %v2618_v10 = vcombine.low %v2594_v7, %v2595_v50 }
0x168d   :  { %v2764_v13 = vcombine.low %v2755_v44, %v2762_v2  ;;  %v2628_v4 = vrot.slane %v2618_v10, %v3820_v9 }
0x168f   :  { %v2778_v49 = vrot.slane %v2764_v13, %v3820_v9  ;;  %v2650_v19 = vcombine.low %v2628_v4, %v2635_v16 }
0x1691   :  { %v2779_v17 = vcombine.low %v2771_v20, %v2778_v49  ;;  %v2658_v22 = vrot.slane %v2650_v19, %v3820_v9 }
0x1693   :  { %3251 = vmatmul.mubr.msk.bf16.vlgmr.msra.gmra.mrb[20].mxu0 %vm410_vm2, %v2779_v17  ;;  %v2666_v18 = vcombine.low %v2658_v22, %v2665_v61 }
0x1695   :  { %3243 = vmatmul.mubr.msk.bf16.vlgmr.msra.gmra.mrb[16].mxu1 %vm410_vm2, %v2666_v18 }
0x1766   :  { %v2829_v38 = vpop.f32.mrb[20].mxu0 }
0x1767   :  { %v3252_v21 = vpop.f32.mrb[21].mxu0 }
0x1768   :  { %v2832_v23 = vpop.f32.mrb[22].mxu0  ;;  %v2716_v25 = vpop.f32.mrb[16].mxu1 }
0x1769   :  { %v3253_v24 = vpop.f32.mrb[23].mxu0  ;;  %v2830_v60 = vadd.f32 %v2829_v38, %v2716_v25  ;;  %v3244_v39 = vpop.f32.mrb[17].mxu1 }
0x176a   :  { %v2719_v8 = vpop.f32.mrb[18].mxu1 }
0x176b   :  { %v2843_v11 = vadd.f32 %v2975_v5, %v2830_v60  ;;  %v2833_v26 = vadd.f32 %v2832_v23, %v2719_v8  ;;  %v3245_v9 = vpop.f32.mrb[19].mxu1 }
0x176d   :  { %v2847_v6 = vcombine.high %v2843_v11, %v2843_v11  ;;  %v2854_v0 = vrot.slane %v2843_v11, %v3880_v63  ;;  %v2844_v27 = vadd.f32 %v2975_v5, %v2833_v26 }
0x176f   :  { %v2861_v28 = vrot.slane %v2847_v6, %v3880_v63  ;;  %v2862_v30 = vcombine.high %v2854_v0, %v2854_v0  ;;  %2890 = vst.msk [vmem:[#allocation15] sm:$0x3] %vm2889_vm11, %v2854_v0  ;;  %v2864_v58 = vcombine.high %v2844_v27, %v2844_v27  ;;  %v2871_v59 = vrot.slane %v2844_v27, %v3880_v63 }
0x1771   :  { %v2863_v14 = vcombine.high %v2861_v28, %v2861_v28  ;;  %2891 = vst.msk [vmem:[#allocation15 + $0x2] sm:$0x3] %vm2889_vm11, %v2862_v30  ;;  %2892 = vst.msk [vmem:[#allocation15 + $0x4] sm:$0x3] %vm2889_vm11, %v2861_v28  ;;  %v2878_v31 = vrot.slane %v2864_v58, %v3880_v63  ;;  %v2879_v32 = vcombine.high %v2871_v59, %v2871_v59 }
0x1772   :  { %2894 = vst.msk [vmem:[#allocation15 + $0x8] sm:$0x3] %vm2889_vm11, %v2871_v59 }
0x1773   :  { %2893 = vst.msk [vmem:[#allocation15 + $0x6] sm:$0x3] %vm2889_vm11, %v2863_v14  ;;  %v2880_v33 = vcombine.high %v2878_v31, %v2878_v31  ;;  %2895 = vst.msk [vmem:[#allocation15 + $0xa] sm:$0x3] %vm2889_vm11, %v2879_v32 }
0x1774   :  { %2896 = vst.msk [vmem:[#allocation15 + $0xc] sm:$0x3] %vm2889_vm11, %v2878_v31 }
0x1775   :  { %2897 = vst.msk [vmem:[#allocation15 + $0xe] sm:$0x3] %vm2889_vm11, %v2880_v33 }
0x1776   :  { %3647 = shalt.err (!%p3644_p2)
}
0x1777   :  { %s3648_s15 = scalar_lea.hbm %s4365_s10, 256 }
0x1778   :  { %p3649_p3 = scmp.ne.s32.totalorder %s4365_s10, %s3648_s15  ;;  %p3652_p4 = scmp.lt.u32.totalorder %s3648_s15, %s4365_s10 }
0x177a   :  { %p3654_p5 = pnand %p3652_p4, %p3649_p3 }
0x177c   :  { %3657 = shalt.err (!%p3654_p5)
}
0x177d   :  { %2909 = dma.vmem_to_hbm [thread:$0]  %s2904_s29, 256, %s4365_s10, [#allocation8], %s3671_s5, %s3671_s5, %s3672_s28  }
0x177e   :  { %3664 = dma.done.wait [#allocation8], 256  }
0x177f   :  { %3665 = vsyncadd [#allocation8], 4294967040 }
0x1780   :  { %2913 = vsyncpa [#allocation7], 1 }
0x1781   :  { %2914 = vsyncpa [#allocation10], 1 }
0x1782   :  { %2915 = vsyncpa [#allocation13], 1 }
0x1783   :  { %2916 = vsyncpa [#allocation8], 1 }

</bundles_post_ra>
